<compile_context>
chip_gen: v7x
topology: tpu7x:2x2x1
jax: 0.10.0
libtpu: 0.0.40
codegen_flags: <defaults>
</compile_context>

<pallas_src>
import jax
import jax.numpy as jnp
from jax.experimental import pallas as pl
from jax.experimental.pallas import tpu as pltpu


def _round_up(x, m):
    return (x + m - 1) // m * m


def _pad2(a, rows, cols):
    pr, pc = rows - a.shape[0], cols - a.shape[1]
    if pr or pc:
        a = jnp.pad(a, ((0, pr), (0, pc)))
    return a


def _vmem_capacity_bytes():
    try:  # capability probe only (not masking kernel errors)
        return int(pltpu.get_tpu_info().vmem_capacity_bytes)
    except Exception:
        return 128 * 2**20  # v5e/v6e physical VMEM


def _buffered_supported():
    try:  # capability probe: does this build accept pipeline_mode=pl.Buffered?
        pl.BlockSpec((8, 128), lambda i: (0, 0), pipeline_mode=pl.Buffered(1))
        return True
    except Exception:
        return False


def _get_activation(name):
    if name == "relu":
        return lambda v: jnp.maximum(v, 0.0)
    if name == "leaky_relu":
        return lambda v: jnp.where(v > 0, v, 0.01 * v)  # torch default slope
    if name == "gelu":
        # exact erf GELU to match torch.nn.functional.gelu's default
        return lambda v: jax.nn.gelu(v, approximate=False)
    raise ValueError(f"Unsupported activation: {name}")


def _make_kernel(activation):
    act = _get_activation(activation)

    def kernel(x_ref, wet_ref, be_ref, wdt_ref, bd_ref, xr_ref, h_ref, acc_ref):
        k = pl.program_id(1)

        @pl.when(k == 0)
        def _init():
            # Fold the decoder bias into the accumulator init: removes a full
            # (tile_b, D_pad) f32 add + extra store pass from the epilogue.
            acc_ref[...] = jnp.broadcast_to(bd_ref[...], acc_ref.shape)

        # Encoder tile: (TB, D) @ (D, TH) on the MXU with f32 accumulation.
        pre = jnp.dot(x_ref[...], wet_ref[...],
                      preferred_element_type=jnp.float32) + be_ref[...]
        h = act(pre)
        h_ref[...] = h.astype(h_ref.dtype)

        # Decoder partial sum for this hidden tile: (TB, TH) @ (TH, D) -> f32 acc.
        acc_ref[...] += jnp.dot(h.astype(wdt_ref.dtype), wdt_ref[...],
                                preferred_element_type=jnp.float32)

        @pl.when(k == pl.num_programs(1) - 1)
        def _finish():
            xr_ref[...] = acc_ref[...].astype(xr_ref.dtype)

    return kernel


def _plan_tiles(B, D, H, cb, ob, budget, tile_b_req, tile_h_req):
    """Pick (tile_b, tile_h) and padded shapes under a VMEM budget."""
    D_pad = _round_up(D, 128)
    B_al = _round_up(B, 16)

    def vmem_need(tb, th, nb, nk, resident):
        w_buf = 1 if resident else 2                        # Buffered(1) when grid-invariant
        return ((2 if nb > 1 else 1) * tb * D_pad * cb      # x tile
                + w_buf * (2 * D_pad * th * cb + th * 4)    # W_enc^T, W_dec^T, b_enc
                + D_pad * 4                                  # b_dec (always resident)
                + 2 * tb * th * ob                           # h output tile
                + 2 * tb * D_pad * ob                        # x_recon output tile
                + tb * D_pad * 4)                            # f32 accumulator scratch

    # tile_h: weights fully resident (one HBM read per kernel) whenever they fit.
    if tile_h_req is not None:
        tile_h = min(_round_up(tile_h_req, 128), _round_up(H, 128))
    else:
        h_full = _round_up(H, 128)
        if 2 * D_pad * h_full * cb <= 0.6 * budget:
            tile_h = h_full                                  # resident
        else:
            tile_h = 512                                     # streamed; multiple of 256
    H_pad = _round_up(H, tile_h)
    nk = H_pad // tile_h
    resident = nk == 1

    # tile_b: large when weights stream (flops per streamed weight byte ~ tile_b);
    # moderate when resident.  Keep >= 2 batch tiles for v7x's 2 TensorCores.
    if tile_b_req is not None:
        tile_b = max(8, _round_up(min(tile_b_req, B_al), 8))
    else:
        tile_b = min(512 if nk > 1 else 256, B_al)
        if B_al // tile_b <= 1 and B_al >= 16:
            tile_b = max(8, B_al // 2)
    B_pad = _round_up(B_al, tile_b)
    nb = B_pad // tile_b

    # Shrink until the working set fits the budget.
    while vmem_need(tile_b, tile_h, nb, nk, resident) > budget:
        if not resident and tile_h > 256:
            tile_h = max(256, tile_h // 2)
        elif tile_b > 64:
            tile_b = max(64, _round_up(tile_b // 2, 8))
        elif tile_h > 128:
            tile_h = max(128, tile_h // 2)
        else:
            break
        H_pad = _round_up(H, tile_h)
        nk = H_pad // tile_h
        resident = resident and nk == 1
        B_pad = _round_up(B_al, tile_b)
        nb = B_pad // tile_b

    need = vmem_need(tile_b, tile_h, nb, nk, resident)
    return D_pad, H_pad, B_pad, tile_b, tile_h, nb, nk, need


def sae_forward(x, w_enc, b_enc, w_dec, b_dec, *, activation="relu",
                tile_b=None, tile_h=None, compute_dtype=jnp.bfloat16,
                out_dtype=jnp.bfloat16, vmem_limit_bytes=None):
    """Fused SAE forward.

    x: [B, D_in]; w_enc: [H, D_in]; b_enc: [H]; w_dec: [D_in, H]; b_dec: [D_in]
    (PyTorch nn.Linear layouts).  Tied weights: pass w_dec = w_enc.T and the tied
    decoder bias as b_dec.  Returns (x_recon [B, D_in], h [B, H]).

    compute_dtype: MXU operand dtype (bf16 default; use jnp.float32 for closer
    parity with the f32 PyTorch reference).  out_dtype: dtype of the h / x_recon
    outputs (bf16 default — they are write-only HBM traffic).
    """
    B, D = x.shape
    H = w_enc.shape[0]
    cd = jnp.dtype(compute_dtype)
    od = jnp.dtype(out_dtype)
    cb, ob = cd.itemsize, od.itemsize

    # Generation-aware VMEM budget: ~48 MiB on v7x (64 MiB/TC), ~96 MiB on v5e/v6e.
    capacity = _vmem_capacity_bytes()
    budget = max(int(0.75 * capacity), 24 * 2**20)

    D_pad, H_pad, B_pad, tb, th, nb, nk, need = _plan_tiles(
        B, D, H, cb, ob, budget, tile_b, tile_h)

    if vmem_limit_bytes is None:
        # 2x headroom over the planned working set, clamped to the generation-aware
        # cap, but never below what the plan itself needs.
        vmem_limit_bytes = int(max(min(max(2 * need, 32 * 2**20), budget),
                                   need + (2 << 20)))

    # Wrapper glue: transpose / pad / cast.  Biases stay f32 (feed f32 accumulators).
    x_p = _pad2(x, B_pad, D_pad).astype(cd)
    wet = _pad2(w_enc.T, D_pad, H_pad).astype(cd)            # (D, H) encoder W^T
    wdt = _pad2(w_dec.T, H_pad, D_pad).astype(cd)            # (H, D) decoder W^T
    be = _pad2(b_enc.reshape(1, H), 1, H_pad).astype(jnp.float32)
    bd = _pad2(b_dec.reshape(1, D), 1, D_pad).astype(jnp.float32)

    cost = pl.CostEstimate(
        flops=4 * B_pad * D_pad * H_pad,
        transcendentals=B_pad * H_pad if activation == "gelu" else 0,
        bytes_accessed=int(B_pad * D_pad * cb
                           + (1 if nk == 1 else nb) * 2 * D_pad * H_pad * cb
                           + (H_pad + D_pad) * 4
                           + B_pad * D_pad * ob + B_pad * H_pad * ob),
    )

    kernel = _make_kernel(activation)
    resident = nk == 1
    use_buffered = _buffered_supported()

    def build(single_buffer):
        def in_spec(shape, imap, constant=False):
            if single_buffer and constant:
                # Grid-invariant block: keep one VMEM copy instead of two.
                return pl.BlockSpec(shape, imap, pipeline_mode=pl.Buffered(1))
            return pl.BlockSpec(shape, imap)

        return pl.pallas_call(
            kernel,
            out_shape=(jax.ShapeDtypeStruct((B_pad, D_pad), od),   # x_recon
                       jax.ShapeDtypeStruct((B_pad, H_pad), od)),  # h
            grid_spec=pltpu.PrefetchScalarGridSpec(
                num_scalar_prefetch=0,
                grid=(nb, nk),
                in_specs=[
                    in_spec((tb, D_pad), lambda i, k: (i, 0)),                     # x
                    in_spec((D_pad, th), lambda i, k: (0, k), constant=resident),  # W_enc^T
                    in_spec((1, th), lambda i, k: (0, k), constant=resident),      # b_enc
                    in_spec((th, D_pad), lambda i, k: (k, 0), constant=resident),  # W_dec^T
                    in_spec((1, D_pad), lambda i, k: (0, 0), constant=True),       # b_dec
                ],
                out_specs=[
                    pl.BlockSpec((tb, D_pad), lambda i, k: (i, 0)),   # x_recon (accum.)
                    pl.BlockSpec((tb, th), lambda i, k: (i, k)),      # h
                ],
                scratch_shapes=[pltpu.VMEM((tb, D_pad), jnp.float32)],
            ),
            compiler_params=pltpu.CompilerParams(
                dimension_semantics=("parallel", "arbitrary"),
                vmem_limit_bytes=vmem_limit_bytes),
            cost_estimate=cost,
        )

    args = (x_p, wet, be, wdt, bd)
    if use_buffered:
        try:
            xr_p, h_p = build(single_buffer=True)(*args)
        except pltpu.LoweringException:
            # Narrow fallback: only if Mosaic rejects pl.Buffered(1) blocks.
            xr_p, h_p = build(single_buffer=False)(*args)
    else:
        xr_p, h_p = build(single_buffer=False)(*args)

    return xr_p[:B, :D], h_p[:B, :H]


def init_sae_params(key, input_dim, hidden_dim, bias_decoder_init=None):
    """Matches the PyTorch module's parameter shapes / xavier_normal_ init:
    std = sqrt(2 / (fan_in + fan_out)); encoder bias zeros; optional constant
    decoder-bias init."""
    k_enc, k_dec = jax.random.split(key)
    std_enc = (2.0 / (input_dim + hidden_dim)) ** 0.5
    std_dec = (2.0 / (hidden_dim + input_dim)) ** 0.5
    w_enc = std_enc * jax.random.normal(k_enc, (hidden_dim, input_dim), jnp.float32)
    w_dec = std_dec * jax.random.normal(k_dec, (input_dim, hidden_dim), jnp.float32)
    b_enc = jnp.zeros((hidden_dim,), jnp.float32)
    b_dec = (jnp.full((input_dim,), bias_decoder_init, jnp.float32)
             if bias_decoder_init is not None
             else jnp.zeros((input_dim,), jnp.float32))
    return w_enc, b_enc, w_dec, b_dec


if __name__ == "__main__":
    # Small but tile-exercising shapes.
    B, D_IN, HIDDEN = 256, 256, 512

    key = jax.random.PRNGKey(0)
    k_x, k_p = jax.random.split(key)
    x = jax.random.normal(k_x, (B, D_IN), jnp.float32)
    w_enc, b_enc, w_dec, b_dec = init_sae_params(k_p, D_IN, HIDDEN,
                                                 bias_decoder_init=0.01)

    # 1) Auto-planned: weights fully resident (nk == 1), >= 2 batch tiles (v7x split).
    xr1, h1 = sae_forward(x, w_enc, b_enc, w_dec, b_dec)
    # 2) Forced hidden-axis streaming (nk == 2): exercises the k-reduction
    #    accumulator init (b_dec fold) / finalize path.
    xr2, h2 = sae_forward(x, w_enc, b_enc, w_dec, b_dec, tile_h=256)
    jax.block_until_ready((xr1, h1, xr2, h2))

    # Pure-JAX f32 reference (same semantics as the PyTorch forward).
    h_ref = jnp.maximum(x @ w_enc.T + b_enc, 0.0)
    xr_ref = h_ref @ w_dec.T + b_dec

    # bf16 MXU operands + bf16 outputs with f32 accumulation -> loose-ish tolerance.
    for xr, h in ((xr1, h1), (xr2, h2)):
        assert jnp.allclose(h.astype(jnp.float32), h_ref, atol=4e-2, rtol=4e-2), "h mismatch"
        assert jnp.allclose(xr.astype(jnp.float32), xr_ref, atol=4e-2, rtol=4e-2), "x_recon mismatch"

    print("KERNEL_OK")
</pallas_src>

<mosaic_0001>
module attributes {stable_mosaic.version = 11 : i64} {
  func.func @kernel(%arg0: i32, %arg1: i32, %arg2: memref<128x256xbf16, #tpu.memory_space<vmem>>, %arg3: memref<256x512xbf16, #tpu.memory_space<vmem>>, %arg4: memref<1x512xf32, #tpu.memory_space<vmem>>, %arg5: memref<512x256xbf16, #tpu.memory_space<vmem>>, %arg6: memref<1x256xf32, #tpu.memory_space<vmem>>, %arg7: memref<128x256xbf16, #tpu.memory_space<vmem>>, %arg8: memref<128x512xbf16, #tpu.memory_space<vmem>>, %arg9: memref<128x256xf32, #tpu.memory_space<vmem>>) attributes {dimension_semantics = [#tpu.dimension_semantics<parallel>, #tpu.dimension_semantics<arbitrary>], iteration_bounds = array<i64: 2, 1>, scalar_prefetch = 0 : i64, scratch_operands = 1 : i64, tpu.core_type = #tpu.core_type<tc>, window_params = [{transform_indices = @transform_0, window_bounds = array<i64: 128, 256>}, {pipeline_mode = #tpu.pipeline_mode<synchronous>, transform_indices = @transform_1, window_bounds = array<i64: 256, 512>}, {pipeline_mode = #tpu.pipeline_mode<synchronous>, transform_indices = @transform_2, window_bounds = array<i64: 1, 512>}, {pipeline_mode = #tpu.pipeline_mode<synchronous>, transform_indices = @transform_3, window_bounds = array<i64: 512, 256>}, {pipeline_mode = #tpu.pipeline_mode<synchronous>, transform_indices = @transform_4, window_bounds = array<i64: 1, 256>}, {transform_indices = @transform_5, window_bounds = array<i64: 128, 256>}, {transform_indices = @transform_6, window_bounds = array<i64: 128, 512>}]} {
    %c0_i32 = arith.constant 0 : i32
    %0 = arith.cmpi eq, %arg1, %c0_i32 : i32
    %1 = arith.extui %0 : i1 to i32
    %c0_i32_0 = arith.constant 0 : i32
    %2 = arith.cmpi ne, %1, %c0_i32_0 : i32
    scf.if %2 {
      %c0_18 = arith.constant 0 : index
      %c0_19 = arith.constant 0 : index
      %22 = vector.load %arg6[%c0_18, %c0_19] : memref<1x256xf32, #tpu.memory_space<vmem>>, vector<1x256xf32>
      %23 = vector.shape_cast %22 : vector<1x256xf32> to vector<1x256xf32>
      %24 = vector.broadcast %23 : vector<1x256xf32> to vector<128x256xf32>
      %c0_20 = arith.constant 0 : index
      %c0_21 = arith.constant 0 : index
      %25 = vector.load %arg9[%c0_20, %c0_21] : memref<128x256xf32, #tpu.memory_space<vmem>>, vector<128x256xf32>
      tpu.vector_store %arg9[%c0_20, %c0_21], %24 {strides = array<i32>} : memref<128x256xf32, #tpu.memory_space<vmem>>, vector<128x256xf32>,
    } else {
    }
    %c0 = arith.constant 0 : index
    %c0_1 = arith.constant 0 : index
    %3 = vector.load %arg2[%c0, %c0_1] : memref<128x256xbf16, #tpu.memory_space<vmem>>, vector<128x256xbf16>
    %c0_2 = arith.constant 0 : index
    %c0_3 = arith.constant 0 : index
    %4 = vector.load %arg3[%c0_2, %c0_3] : memref<256x512xbf16, #tpu.memory_space<vmem>>, vector<256x512xbf16>
    %cst = arith.constant dense<0.000000e+00> : vector<128x512xf32>
    %5 = tpu.matmul %3, %4, %cst {dimension_numbers = #tpu.dot_dimension_numbers<[1], [0], [0], [1], [0, 0, 1, 1], [], []>} : vector<128x256xbf16>, vector<256x512xbf16>, vector<128x512xf32> -> vector<128x512xf32>
    %c0_4 = arith.constant 0 : index
    %c0_5 = arith.constant 0 : index
    %6 = vector.load %arg4[%c0_4, %c0_5] : memref<1x512xf32, #tpu.memory_space<vmem>>, vector<1x512xf32>
    %7 = vector.broadcast %6 : vector<1x512xf32> to vector<128x512xf32>
    %8 = arith.addf %5, %7 : vector<128x512xf32>
    %cst_6 = arith.constant 0.000000e+00 : f32
    %9 = vector.broadcast %cst_6 : f32 to vector<128x512xf32>
    %10 = arith.maximumf %8, %9 : vector<128x512xf32>
    %11 = arith.truncf %10 : vector<128x512xf32> to vector<128x512xbf16>
    %c0_7 = arith.constant 0 : index
    %c0_8 = arith.constant 0 : index
    %12 = vector.load %arg8[%c0_7, %c0_8] : memref<128x512xbf16, #tpu.memory_space<vmem>>, vector<128x512xbf16>
    tpu.vector_store %arg8[%c0_7, %c0_8], %11 {strides = array<i32>} : memref<128x512xbf16, #tpu.memory_space<vmem>>, vector<128x512xbf16>,
    %c0_9 = arith.constant 0 : index
    %c0_10 = arith.constant 0 : index
    %13 = vector.load %arg9[%c0_9, %c0_10] : memref<128x256xf32, #tpu.memory_space<vmem>>, vector<128x256xf32>
    %14 = arith.truncf %10 : vector<128x512xf32> to vector<128x512xbf16>
    %c0_11 = arith.constant 0 : index
    %c0_12 = arith.constant 0 : index
    %15 = vector.load %arg5[%c0_11, %c0_12] : memref<512x256xbf16, #tpu.memory_space<vmem>>, vector<512x256xbf16>
    %cst_13 = arith.constant dense<0.000000e+00> : vector<128x256xf32>
    %16 = tpu.matmul %14, %15, %cst_13 {dimension_numbers = #tpu.dot_dimension_numbers<[1], [0], [0], [1], [0, 0, 1, 1], [], []>} : vector<128x512xbf16>, vector<512x256xbf16>, vector<128x256xf32> -> vector<128x256xf32>
    %17 = arith.addf %13, %16 : vector<128x256xf32>
    %c0_14 = arith.constant 0 : index
    %c0_15 = arith.constant 0 : index
    %18 = vector.load %arg9[%c0_14, %c0_15] : memref<128x256xf32, #tpu.memory_space<vmem>>, vector<128x256xf32>
    tpu.vector_store %arg9[%c0_14, %c0_15], %17 {strides = array<i32>} : memref<128x256xf32, #tpu.memory_space<vmem>>, vector<128x256xf32>,
    %c0_i32_16 = arith.constant 0 : i32
    %19 = arith.cmpi eq, %arg1, %c0_i32_16 : i32
    %20 = arith.extui %19 : i1 to i32
    %c0_i32_17 = arith.constant 0 : i32
    %21 = arith.cmpi ne, %20, %c0_i32_17 : i32
    scf.if %21 {
      %c0_18 = arith.constant 0 : index
      %c0_19 = arith.constant 0 : index
      %22 = vector.load %arg9[%c0_18, %c0_19] : memref<128x256xf32, #tpu.memory_space<vmem>>, vector<128x256xf32>
      %23 = arith.truncf %22 : vector<128x256xf32> to vector<128x256xbf16>
      %c0_20 = arith.constant 0 : index
      %c0_21 = arith.constant 0 : index
      %24 = vector.load %arg7[%c0_20, %c0_21] : memref<128x256xbf16, #tpu.memory_space<vmem>>, vector<128x256xbf16>
      tpu.vector_store %arg7[%c0_20, %c0_21], %23 {strides = array<i32>} : memref<128x256xbf16, #tpu.memory_space<vmem>>, vector<128x256xbf16>,
    } else {
    }
    return
  }
  func.func @transform_0(%arg0: i32, %arg1: i32) -> (i32, i32) {
    %c0_i32 = arith.constant 0 : i32
    %c0_i32_0 = arith.constant 0 : i32
    return %arg0, %c0_i32 : i32, i32
  }
  func.func @transform_1(%arg0: i32, %arg1: i32) -> (i32, i32) {
    %c0_i32 = arith.constant 0 : i32
    %c0_i32_0 = arith.constant 0 : i32
    return %c0_i32, %arg1 : i32, i32
  }
  func.func @transform_2(%arg0: i32, %arg1: i32) -> (i32, i32) {
    %c0_i32 = arith.constant 0 : i32
    %c0_i32_0 = arith.constant 0 : i32
    return %c0_i32, %arg1 : i32, i32
  }
  func.func @transform_3(%arg0: i32, %arg1: i32) -> (i32, i32) {
    %c0_i32 = arith.constant 0 : i32
    %c0_i32_0 = arith.constant 0 : i32
    return %arg1, %c0_i32 : i32, i32
  }
  func.func @transform_4(%arg0: i32, %arg1: i32) -> (i32, i32) {
    %c0_i32 = arith.constant 0 : i32
    %c0_i32_0 = arith.constant 0 : i32
    %c0_i32_1 = arith.constant 0 : i32
    return %c0_i32, %c0_i32_0 : i32, i32
  }
  func.func @transform_5(%arg0: i32, %arg1: i32) -> (i32, i32) {
    %c0_i32 = arith.constant 0 : i32
    %c0_i32_0 = arith.constant 0 : i32
    return %arg0, %c0_i32 : i32, i32
  }
  func.func @transform_6(%arg0: i32, %arg1: i32) -> (i32, i32) {
    %c0_i32 = arith.constant 0 : i32
    return %arg0, %arg1 : i32, i32
  }
}

</mosaic_0001>

<bundles_post_ra>
// kernel: tpu_custom_call.1
= control target key start
LH: loop header
LB: loop body
LE: loop exit
PB: predicated region body
PF: predicated region fallthrough
CT: control target
= control target key end

     0   :  { %12 = vsyncpa [#allocation4], 0  ;;  %s3891_s0 = inlined_call_operand.hbm [shape: bf16[256,256], index: 0, kind: input, shape index: {}]   ;;  %s3892_s1 = inlined_call_operand.hbm [shape: bf16[256,512], index: 1, kind: input, shape index: {}]   ;;  %s3893_s2 = inlined_call_operand.vmem [shape: f32[1,512], index: 2, kind: input, shape index: {}]   ;;  %s3894_s3 = inlined_call_operand.hbm [shape: bf16[512,256], index: 3, kind: input, shape index: {}]   ;;  %s3895_s4 = inlined_call_operand.vmem [shape: f32[1,256], index: 4, kind: input, shape index: {}]   ;;  %s3896_s5 = inlined_call_operand.hbm [shape: bf16[256,256], index: 5, kind: output, shape index: {0}]   ;;  %s3897_s6 = inlined_call_operand.hbm [shape: bf16[256,512], index: 6, kind: output, shape index: {1}]  }
   0x1   :  { %14 = vsyncpa [#allocation4 + $0x1], 0 }
   0x2   :  { %15 = vsyncpa [#allocation7], 0 }
   0x3   :  { %16 = vsyncpa [#allocation5], 0 }
   0x4   :  { %18 = vsyncpa [#allocation5 + $0x1], 0 }
   0x5   :  { %19 = vsyncpa [#allocation11], 0 }
   0x6   :  { %21 = vsyncpa [#allocation11 + $0x1], 0  ;;  %s3345_s21 = smov 0   ;;  %s3347_s22 = smov 0  }
   0x7   :  { %s3349_s23 = smov 0   ;;  %s3351_s24 = smov 0  }
   0x8   :  { %s3353_s25 = smov 0   ;;  %s3355_s26 = smov 0  }
   0x9 LB: > { %s2474_s27 = sadd.s32 4294967295, %s3295_s26   ;;  %s2475_s28 = sadd.s32 4294967294, %s3295_s26   ;;  %s3295_s26 = sphi %s3355_s26, %s27_s26   ;;  %s3291_s25 = sphi %s3353_s25, %s3924_s25   ;;  %s3287_s24 = sphi %s3351_s24, %s3923_s24   ;;  %s3283_s23 = sphi %s3349_s23, %s3922_s23   ;;  %s3279_s22 = sphi %s3347_s22, %s3921_s22   ;;  %s3275_s21 = sphi %s3345_s21, %s3920_s21  }
   0xa   : > { %p59_p0 = scmp.ne.s32.totalorder %s3279_s22, %s3275_s21  ;;  %p3379_p1 = scmp.eq.s32.totalorder %s2474_s27, 0 }
   0xb   : > { %p3383_p2 = scmp.eq.s32.totalorder %s2474_s27, 1  ;;  %p188_p3 = scmp.eq.s32.totalorder %s2475_s28, 1 }
   0xc   : > { %s3904_s29 = scalar_select %p3379_p1, 1, 0 }
   0xd   : > { %p3389_p4 = por %p3379_p1, %p59_p0  ;;  %p2476_p5 = scmp.ge.s32.totalorder %s3295_s26, 1 }
   0xe   : > { %p3394_p6 = por %p188_p3, %p59_p0  ;;  %p223_p7 = scmp.lt.s32.totalorder %s3295_s26, 3 }
   0xf   : > { %s3906_s7 = scalar_select %p3389_p4, 1, 0 }
  0x10   : > { %s3907_s8 = scalar_select %p3394_p6, 1, 0 }
  0x11   : > { %p3399_p8 = pnand %p2476_p5, %p223_p7  ;;  %s3297_s10 = smov [#allocation6]  }
  0x12   : > { %3908 = sst [smem:[#allocation16_spill]] %s3907_s8  ;;  %s238_s11 = sshll.u32 %s3297_s10, 4  ;;  %s3403_s11 = int_to_ptr.vmem [resolvable:$true] %s238_s11 }
  0x13   : > { %p2793_p9 = pneg %p3399_p8  ;;  %s3298_s13 = smov [#allocation8]  }
  0x14   : > { %s263_s14 = sshll.u32 %s3298_s13, 4  ;;  %s3091_s17 = scalar_lea.hbm %s3892_s1, 8192  ;;  %s3414_s14 = int_to_ptr.vmem [resolvable:$true] %s263_s14 }
  0x15   : > { %p3410_p11 = pnand %p2793_p9, %p3379_p1  ;;  %p3092_p12 = scmp.ne.s32.totalorder %s3892_s1, %s3091_s17 }
  0x16   : > { %p3098_p5 = scmp.lt.u32.totalorder %s3091_s17, %s3892_s1 }
  0x17   : > { %p3093_p13 = pneg %p3410_p11 }
  0x19   : > { %p3094_p0 = pnand %p3093_p13, %p3092_p12 }
  0x1b   : > { %p3095_p3 = pneg %p3094_p0 }
  0x1d   : > { %p3100_p7 = pnand %p3098_p5, %p3095_p3 }
  0x1f   : > { %3103 = shalt.err (!%p3100_p7)
}
  0x20   : > { %s3104_s28 = scalar_lea.vmem %s3403_s11, 8192  ;;  %p3112_p1 = scmp.lt.s32.totalorder %s3403_s11, %s3403_s11 }
  0x21   : > { %p3105_p9 = scmp.ne.s32.totalorder %s3403_s11, %s3104_s28  ;;  %p3113_p12 = scmp.lt.s32.totalorder %s3104_s28, %s3104_s28 }
  0x23   : > { %p3107_p10 = pnand %p3105_p9, %p3093_p13  ;;  %p3114_p0 = por %p3113_p12, %p3112_p1 }
  0x25   : > { %p3108_p6 = pneg %p3107_p10 }
  0x27   : > { %p3115_p4 = pnand %p3114_p0, %p3108_p6 }
  0x29   : > { %3118 = shalt.err (!%p3115_p4)
}
  0x2a   : > { %s3299_s10 = smov 256   ;;  %s3300_s13 = smov 16  }
  0x2b   : > { %2796 = dma.hbm_to_vmem [thread:$0]  (!%p3410_p11), %s3892_s1, 8192, %s3403_s11, [#allocation7], %s3299_s10, %s3299_s10, %s3300_s13  }
  0x2c   : > { %s3119_s19 = scalar_lea.hbm %s3894_s3, 8192 }
  0x2d   : > { %p3120_p1 = scmp.ne.s32.totalorder %s3894_s3, %s3119_s19  ;;  %p3126_p10 = scmp.lt.u32.totalorder %s3119_s19, %s3894_s3 }
  0x2f   : > { %p3122_p4 = pnand %p3120_p1, %p3093_p13 }
  0x31   : > { %p3123_p6 = pneg %p3122_p4 }
  0x33   : > { %p3128_p3 = pnand %p3126_p10, %p3123_p6 }
  0x35   : > { %3131 = shalt.err (!%p3128_p3)
}
  0x36   : > { %s3132_s11 = scalar_lea.vmem %s3414_s14, 8192  ;;  %p3140_p12 = scmp.lt.s32.totalorder %s3414_s14, %s3414_s14 }
  0x37   : > { %p3133_p5 = scmp.ne.s32.totalorder %s3414_s14, %s3132_s11  ;;  %p3141_p0 = scmp.lt.s32.totalorder %s3132_s11, %s3132_s11 }
  0x39   : > { %p3135_p7 = pnand %p3133_p5, %p3093_p13  ;;  %p3142_p1 = por %p3141_p0, %p3140_p12 }
  0x3b   : > { %p3136_p9 = pneg %p3135_p7 }
  0x3d   : > { %p3143_p4 = pnand %p3142_p1, %p3136_p9 }
  0x3f   : > { %3146 = shalt.err (!%p3143_p4)
}
  0x40   : > { %s3902_s8 = smov 128   ;;  %s3302_s10 = smov 8  }
  0x41   : > { %2799 = dma.hbm_to_vmem [thread:$0]  (!%p3410_p11), %s3894_s3, 8192, %s3414_s14, [#allocation7], %s3902_s8, %s3902_s8, %s3302_s10  }
  0x42   : > { %s39_s16 = sadd.s32 1, %s3291_s25  ;;  %s46_s17 = sadd.s32 1, %s3283_s23 }
  0x43   : > { %p41_p13 = scmp.ge.s32.totalorder %s39_s16, 2  ;;  %p53_p6 = scmp.ne.s32.totalorder %s3283_s23, %s3279_s22 }
  0x44   : > { %p54_p10 = scmp.eq.s32.totalorder %s3295_s26, 0  ;;  %p2813_p3 = scmp.lt.s32.totalorder %s3295_s26, 2 }
  0x45   : > { %s3926_s16 = smov (%p41_p13, %s39_s16), 0  ;;  %p3481_p7 = por %p3383_p2, %p53_p6 }
  0x46   : > { %p55_p5 = por %p54_p10, %p53_p6  ;;  %s43_s18 = ssub.s32 %s3291_s25, %s3926_s16 }
  0x47   : > { %s3911_s12 = scalar_select %p3481_p7, 1, 0 }
  0x48   : > { %s280_s19 = sand.u32 1, %s3283_s23   ;;  %p44_p9 = scmp.eq.s32.totalorder %s43_s18, 0 }
  0x49   : > { %s2481_s14 = sshll.u32 %s280_s19, 7  ;;  %s2694_s20 = sshll.u32 %s3291_s25, 11 }
  0x4a   : > { %s3490_s27 = scalar_select %p44_p9, %s3283_s23, %s46_s17  }
  0x4b   : > { %s3495_s13 = scalar_lea.hbm %s3891_s0, %s2694_s20  ;;  %s284_s30 = scalar_lea.vmem [#allocation3], %s2481_s14 }
  0x4c   : > { %s292_s15 = sshll.u32 %s284_s30, 4  ;;  %p3499_p2 = pnand %p2813_p3, %p55_p5  ;;  %s3503_s15 = int_to_ptr.vmem [resolvable:$true] %s292_s15 }
  0x4d   : > { %s3505_s17 = scalar_lea.sflag [#allocation4], %s280_s19  ;;  %s3147_s18 = scalar_lea.hbm %s3495_s13, 2048 }
  0x4e   : > { %p3148_p11 = scmp.ne.s32.totalorder %s3495_s13, %s3147_s18  ;;  %p3149_p12 = pneg %p3499_p2 }
  0x4f   : > { %s3152_s28 = scalar_lea.hbm %s3891_s0, 4096  ;;  %p3153_p4 = scmp.lt.u32.totalorder %s3495_s13, %s3891_s0 }
  0x50   : > { %p3150_p0 = pnand %p3149_p12, %p3148_p11  ;;  %p3154_p13 = scmp.lt.u32.totalorder %s3152_s28, %s3147_s18 }
  0x51   : > { %p3156_p10 = scmp.lt.u32.totalorder %s3147_s18, %s3495_s13 }
  0x52   : > { %p3151_p1 = pneg %p3150_p0  ;;  %p3155_p6 = por %p3154_p13, %p3153_p4 }
  0x54   : > { %p3157_p3 = por %p3156_p10, %p3155_p6 }
  0x56   : > { %p3158_p5 = pnand %p3157_p3, %p3151_p1 }
  0x58   : > { %3161 = shalt.err (!%p3158_p5)
}
  0x59   : > { %s3162_s19 = scalar_lea.vmem %s3503_s15, 2048  ;;  %s3303_s14 = smov [#allocation3]  }
  0x5a   : > { %p3163_p9 = scmp.ne.s32.totalorder %s3503_s15, %s3162_s19  ;;  %s3167_s20 = sshll.u32 %s3303_s14, 4  ;;  %s3168_s20 = int_to_ptr.vmem [resolvable:$false] %s3167_s20 }
  0x5b   : > { %s3169_s11 = scalar_lea.vmem %s3168_s20, 4096  ;;  %p3170_p7 = scmp.lt.s32.totalorder %s3503_s15, %s3168_s20 }
  0x5c   : > { %p3165_p11 = pnand %p3163_p9, %p3149_p12  ;;  %p3171_p4 = scmp.lt.s32.totalorder %s3169_s11, %s3162_s19 }
  0x5e   : > { %p3166_p0 = pneg %p3165_p11  ;;  %p3172_p13 = por %p3171_p4, %p3170_p7 }
  0x60   : > { %p3173_p6 = pnand %p3172_p13, %p3166_p0 }
  0x62   : > { %3176 = shalt.err (!%p3173_p6)
}
  0x63   : > { %s3913_s18 = smov 128   ;;  %304 = sbr.rel (%p3399_p8) target bundleno = 751 (0x2ef), region = 40 }
  0x64   : > { %2803 = dma.hbm_to_vmem [thread:$0]  (!%p3499_p2), %s3495_s13, 2048, %s3503_s15, %s3505_s17, %s3913_s18, %s3913_s18, %s3302_s10  }
  0x65   : > { %s3539_s28 = sand.u32 (!%p3399_p8), 1, %s3279_s22   ;;  %p3914_p7 = scmp.ne.s32.totalorder (!%p3399_p8), %s3906_s7, 0 }
  0x66   : > { %s2486_s30 = sshll.u32 (!%p3399_p8), %s3539_s28, 7  ;;  %s307_s19 = scalar_lea.sflag (!%p3399_p8), [#allocation4], %s3539_s28 }
  0x67   : > { %s3545_s8 = scalar_lea.vmem (!%p3399_p8), [#allocation3], %s2486_s30 }
  0x6a   : > { %3258 = dma.done.wait (%p3914_p7), %s307_s19, 2048  }
  0x6b   : > { %3260 = vsyncadd (%p3914_p7), %s307_s19, 4294965248  ;;  %p3915_p2 = scmp.ne.s32.totalorder %s3904_s29, 0 }
  0x6d   : > { %3262 = dma.done.wait (%p3915_p2), [#allocation7], 16384  }
  0x6e   : > { %3264 = vsyncadd (%p3915_p2), [#allocation7], 4294950912  ;;  %v2875_v0 = vld [vmem:[#allocation6 + $0x4] ss:$16 sps:$4 sm:$0xff]   ;;  %v2877_v1 = vld [vmem:[#allocation6] ss:$16 sps:$4 sm:$0xff]  }
  0x6f   : > { %917 = vmatprep.subr.bf16.mxu1 %v2875_v0  ;;  %v2878_v2 = vld [vmem:[#allocation6 + $0x24] ss:$16 sps:$4 sm:$0xff]   ;;  %v2880_v3 = vld [vmem:[#allocation6 + $0x20] ss:$16 sps:$4 sm:$0xff]   ;;  %v2928_v36 = vld [vmem:[#allocation6 + $0xc] ss:$16 sps:$4 sm:$0xff]  }
  0x70   : > { %918 = vmatpush1.bf16.msra.mxu1 %v2877_v1  ;;  %v2881_v4 = vld [vmem:[#allocation6 + $0x44] ss:$16 sps:$4 sm:$0xff]   ;;  %v2883_v5 = vld [vmem:[#allocation6 + $0x40] ss:$16 sps:$4 sm:$0xff]   ;;  %v2926_v40 = vld [vmem:[#allocation6 + $0x8] ss:$16 sps:$4 sm:$0xff]  }
  0x71   : > { %919 = vmatprep.subr.bf16.mxu1 %v2878_v2  ;;  %v2884_v6 = vld [vmem:[#allocation6 + $0x64] ss:$16 sps:$4 sm:$0xff]   ;;  %v2886_v7 = vld [vmem:[#allocation6 + $0x60] ss:$16 sps:$4 sm:$0xff]   ;;  %v2931_v42 = vld [vmem:[#allocation6 + $0x2c] ss:$16 sps:$4 sm:$0xff]  }
  0x72   : > { %v2887_v8 = vld [vmem:[#allocation6 + $0x84] ss:$16 sps:$4 sm:$0xff]   ;;  %v2889_v9 = vld [vmem:[#allocation6 + $0x80] ss:$16 sps:$4 sm:$0xff]   ;;  %v2929_v45 = vld [vmem:[#allocation6 + $0x28] ss:$16 sps:$4 sm:$0xff]  }
  0x73   : > { %v2890_v10 = vld [vmem:[#allocation6 + $0xa4] ss:$16 sps:$4 sm:$0xff]   ;;  %v2892_v11 = vld [vmem:[#allocation6 + $0xa0] ss:$16 sps:$4 sm:$0xff]   ;;  %v2937_v47 = vld [vmem:[#allocation6 + $0x4c] ss:$16 sps:$4 sm:$0xff]  }
  0x74   : > { %920 = vmatpush1.bf16.msra.mxu1 %v2880_v3  ;;  %v2893_v12 = vld [vmem:[#allocation6 + $0xc4] ss:$16 sps:$4 sm:$0xff]   ;;  %v2895_v14 = vld [vmem:[#allocation6 + $0xc0] ss:$16 sps:$4 sm:$0xff]   ;;  %v2935_v48 = vld [vmem:[#allocation6 + $0x48] ss:$16 sps:$4 sm:$0xff]  }
  0x75   : > { %921 = vmatprep.subr.bf16.mxu1 %v2881_v4  ;;  %v3556_v13 = vld [vmem:[%s3545_s8 + $0x4] ss:$8 sps:$4 sm:$0xff]   ;;  %v2898_v16 = vld [vmem:[#allocation6 + $0xe0] ss:$16 sps:$4 sm:$0xff]   ;;  %v2998_v34 = vld [vmem:[#allocation8 + $0x14] ss:$8 sps:$4 sm:$0xff]  }
  0x76   : > { %v2896_v15 = vld [vmem:[#allocation6 + $0xe4] ss:$16 sps:$4 sm:$0xff]   ;;  %949 = vmatprep.mubr.bf16.mxu1 %v3556_v13  ;;  %v2901_v18 = vld [vmem:[#allocation6 + $0x100] ss:$16 sps:$4 sm:$0xff]   ;;  %v2940_v50 = vld [vmem:[#allocation6 + $0x6c] ss:$16 sps:$4 sm:$0xff]  }
  0x77   : > { %v2899_v17 = vld [vmem:[#allocation6 + $0x104] ss:$16 sps:$4 sm:$0xff]   ;;  %v2904_v20 = vld [vmem:[#allocation6 + $0x120] ss:$16 sps:$4 sm:$0xff]   ;;  %v2938_v55 = vld [vmem:[#allocation6 + $0x68] ss:$16 sps:$4 sm:$0xff]  }
  0x78   : > { %922 = vmatpush1.bf16.msra.mxu1 %v2883_v5  ;;  %v2902_v19 = vld [vmem:[#allocation6 + $0x124] ss:$16 sps:$4 sm:$0xff]   ;;  %v2907_v22 = vld [vmem:[#allocation6 + $0x140] ss:$16 sps:$4 sm:$0xff]   ;;  %v2946_v56 = vld [vmem:[#allocation6 + $0x8c] ss:$16 sps:$4 sm:$0xff]  }
  0x79   : > { %923 = vmatprep.subr.bf16.mxu1 %v2884_v6  ;;  %v2905_v21 = vld [vmem:[#allocation6 + $0x144] ss:$16 sps:$4 sm:$0xff]   ;;  %v2910_v24 = vld [vmem:[#allocation6 + $0x160] ss:$16 sps:$4 sm:$0xff]   ;;  %v2944_v60 = vld [vmem:[#allocation6 + $0x88] ss:$16 sps:$4 sm:$0xff]  }
  0x7a   : > { %v2908_v23 = vld [vmem:[#allocation6 + $0x164] ss:$16 sps:$4 sm:$0xff]   ;;  %v2913_v26 = vld [vmem:[#allocation6 + $0x180] ss:$16 sps:$4 sm:$0xff]   ;;  %v2949_v62 = vld [vmem:[#allocation6 + $0xac] ss:$16 sps:$4 sm:$0xff]  }
  0x7b   : > { %v2911_v25 = vld [vmem:[#allocation6 + $0x184] ss:$16 sps:$4 sm:$0xff]   ;;  %v2916_v28 = vld [vmem:[#allocation6 + $0x1a0] ss:$16 sps:$4 sm:$0xff]   ;;  %v2947_v1 = vld [vmem:[#allocation6 + $0xa8] ss:$16 sps:$4 sm:$0xff]  }
  0x7c   : > { %924 = vmatpush1.bf16.msra.mxu1 %v2886_v7  ;;  %v2914_v27 = vld [vmem:[#allocation6 + $0x1a4] ss:$16 sps:$4 sm:$0xff]   ;;  %v2919_v30 = vld [vmem:[#allocation6 + $0x1c0] ss:$16 sps:$4 sm:$0xff]   ;;  %v2955_v2 = vld [vmem:[#allocation6 + $0xcc] ss:$16 sps:$4 sm:$0xff]  }
  0x7d   : > { %925 = vmatprep.subr.bf16.mxu1 %v2887_v8  ;;  %v2917_v29 = vld [vmem:[#allocation6 + $0x1c4] ss:$16 sps:$4 sm:$0xff]   ;;  %v2997_v33 = vld [vmem:[#allocation8] ss:$8 sps:$4 sm:$0xff]   ;;  %v3000_v37 = vld [vmem:[#allocation8 + $0x10] ss:$8 sps:$4 sm:$0xff]  }
  0x7e   : > { %v2920_v31 = vld [vmem:[#allocation6 + $0x1e4] ss:$16 sps:$4 sm:$0xff]   ;;  %v2922_v35 = vld [vmem:[#allocation6 + $0x1e0] ss:$16 sps:$4 sm:$0xff]   ;;  %v2953_v6 = vld [vmem:[#allocation6 + $0xc8] ss:$16 sps:$4 sm:$0xff]  }
  0x7f   : > { %v2995_v32 = vld [vmem:[#allocation8 + $0x4] ss:$8 sps:$4 sm:$0xff]   ;;  %v3560_v38 = vld [vmem:[%s3545_s8] ss:$8 sps:$4 sm:$0xff]   ;;  %v3563_v41 = vld [vmem:[%s3545_s8 + $0x14] ss:$8 sps:$4 sm:$0xff]  }
  0x80   : > { %926 = vmatpush1.bf16.msra.mxu1 %v2889_v9  ;;  %1847 = vmatprep.subr.bf16.mxu0 %v2995_v32  ;;  %v3001_v39 = vld [vmem:[#allocation8 + $0x24] ss:$8 sps:$4 sm:$0xff]   ;;  %v3003_v43 = vld [vmem:[#allocation8 + $0x20] ss:$8 sps:$4 sm:$0xff]   ;;  %v3004_v44 = vld [vmem:[#allocation8 + $0x34] ss:$8 sps:$4 sm:$0xff]  }
  0x81   : > { %927 = vmatprep.subr.bf16.mxu1 %v2890_v10  ;;  %1848 = vmatpush1.bf16.msra.mxu0 %v2997_v33  ;;  %v3568_v46 = vld [vmem:[%s3545_s8 + $0x10] ss:$8 sps:$4 sm:$0xff]   ;;  %v3007_v51 = vld [vmem:[#allocation8 + $0x44] ss:$8 sps:$4 sm:$0xff]   ;;  %v3009_v53 = vld [vmem:[#allocation8 + $0x40] ss:$8 sps:$4 sm:$0xff]  }
  0x82   : > { %1849 = vmatprep.subr.bf16.mxu0 %v2998_v34  ;;  %v3006_v49 = vld [vmem:[#allocation8 + $0x30] ss:$8 sps:$4 sm:$0xff]   ;;  %v3571_v52 = vld [vmem:[%s3545_s8 + $0x24] ss:$8 sps:$4 sm:$0xff]   ;;  %v3010_v54 = vld [vmem:[#allocation8 + $0x54] ss:$8 sps:$4 sm:$0xff]  }
  0x83   : > { %v3012_v57 = vld [vmem:[#allocation8 + $0x50] ss:$8 sps:$4 sm:$0xff]   ;;  %v3576_v58 = vld [vmem:[%s3545_s8 + $0x20] ss:$8 sps:$4 sm:$0xff]   ;;  %v3013_v59 = vld [vmem:[#allocation8 + $0x64] ss:$8 sps:$4 sm:$0xff]  }
  0x84   : > { %928 = vmatpush1.bf16.msra.mxu1 %v2892_v11  ;;  %v3579_v61 = vld [vmem:[%s3545_s8 + $0x34] ss:$8 sps:$4 sm:$0xff]   ;;  %v3015_v63 = vld [vmem:[#allocation8 + $0x60] ss:$8 sps:$4 sm:$0xff]   ;;  %v3018_v3 = vld [vmem:[#allocation8 + $0x70] ss:$8 sps:$4 sm:$0xff]  }
  0x85   : > { %929 = vmatprep.subr.bf16.mxu1 %v2893_v12  ;;  %1850 = vmatpush1.bf16.msra.mxu0 %v3000_v37  ;;  %v3016_v0 = vld [vmem:[#allocation8 + $0x74] ss:$8 sps:$4 sm:$0xff]   ;;  %v3584_v4 = vld [vmem:[%s3545_s8 + $0x30] ss:$8 sps:$4 sm:$0xff]   ;;  %v3019_v5 = vld [vmem:[#allocation8 + $0x84] ss:$8 sps:$4 sm:$0xff]  }
  0x86   : > { %1851 = vmatprep.subr.bf16.mxu0 %v3001_v39  ;;  %v3587_v7 = vld [vmem:[%s3545_s8 + $0x44] ss:$8 sps:$4 sm:$0xff]   ;;  %v3021_v9 = vld [vmem:[#allocation8 + $0x80] ss:$8 sps:$4 sm:$0xff]   ;;  %v3022_v10 = vld [vmem:[#allocation8 + $0x94] ss:$8 sps:$4 sm:$0xff]  }
  0x87   : > { %v2958_v8 = vld [vmem:[#allocation6 + $0xec] ss:$16 sps:$4 sm:$0xff]   ;;  %v2956_v11 = vld [vmem:[#allocation6 + $0xe8] ss:$16 sps:$4 sm:$0xff]   ;;  %s2490_s9 = sshll.u32 %s3539_s28, 8  ;;  %s2746_s13 = sshll.u32 %s3287_s24, 12 }
  0x88   : > { %930 = vmatpush1.bf16.msra.mxu1 %v2895_v14  ;;  %v2964_v12 = vld [vmem:[#allocation6 + $0x10c] ss:$16 sps:$4 sm:$0xff]   ;;  %v3024_v14 = vld [vmem:[#allocation8 + $0x90] ss:$8 sps:$4 sm:$0xff]   ;;  %v2979_v34 = vld [vmem:[%s3545_s8 + $0x60] ss:$8 sps:$4 sm:$0xff]   ;;  %s3744_s20 = scalar_lea.hbm %s3897_s6, %s2746_s13 }
  0x89   : > { %931 = vmatprep.subr.bf16.mxu1 %v2896_v15  ;;  %1852 = vmatpush1.bf16.msra.mxu0 %v3003_v43  ;;  %v3592_v15 = vld [vmem:[%s3545_s8 + $0x40] ss:$8 sps:$4 sm:$0xff]   ;;  %v2982_v33 = vld [vmem:[#allocation6 + $0x18c] ss:$16 sps:$4 sm:$0xff]   ;;  %s3645_s10 = scalar_lea.vmem [#allocation10], %s2490_s9  ;;  %s2290_s11 = scalar_lea.sflag [#allocation11], %s3539_s28 }
  0x8a   : > { %1853 = vmatprep.subr.bf16.mxu0 %v3004_v44  ;;  %v2974_v32 = vld [vmem:[#allocation6 + $0x168] ss:$16 sps:$4 sm:$0xff]   ;;  %v2985_v37 = vld [vmem:[#allocation6 + $0x1ac] ss:$16 sps:$4 sm:$0xff]   ;;  %s2323_s15 = sshll.u32 %s3645_s10, 4  ;;  %p3916_p12 = scmp.ne.s32.totalorder %s3911_s12, 0  ;;  %s3746_s15 = int_to_ptr.vmem [resolvable:$true] %s2323_s15 }
  0x8b   : > { %v2983_v39 = vld [vmem:[#allocation6 + $0x1a8] ss:$16 sps:$4 sm:$0xff]   ;;  %v2994_v44 = vld [vmem:[#allocation6 + $0x1ec] ss:$16 sps:$4 sm:$0xff]   ;;  %s3177_s18 = scalar_lea.vmem %s3746_s15, 4096  ;;  %s3304_s19 = smov [#allocation10]  }
  0x8c   : > { %932 = vmatpush1.bf16.msra.mxu1 %v2898_v16  ;;  %v3025_v16 = vld [vmem:[#allocation8 + $0xa4] ss:$8 sps:$4 sm:$0xff]   ;;  %v2989_v43 = vld [vmem:[#allocation6 + $0x1c8] ss:$16 sps:$4 sm:$0xff]   ;;  %p3178_p8 = scmp.ne.s32.totalorder %s3746_s15, %s3177_s18 }
  0x8d   : > { %933 = vmatprep.subr.bf16.mxu1 %v2899_v17  ;;  %1854 = vmatpush1.bf16.msra.mxu0 %v3006_v49  ;;  %v2962_v17 = vld [vmem:[#allocation6 + $0x108] ss:$16 sps:$4 sm:$0xff]  }
  0x8e   : > { %1855 = vmatprep.subr.bf16.mxu0 %v3007_v51  ;;  %v3039_v49 = vld [vmem:[#allocation8 + $0xe0] ss:$8 sps:$4 sm:$0xff]   ;;  %p3179_p1 = pnand %p3178_p8, %p3916_p12 }
  0x90   : > { %934 = vmatpush1.bf16.msra.mxu1 %v2901_v18  ;;  %v3595_v18 = vld [vmem:[%s3545_s8 + $0x54] ss:$8 sps:$4 sm:$0xff]   ;;  %p3180_p10 = pneg %p3179_p1 }
  0x91   : > { %935 = vmatprep.subr.bf16.mxu1 %v2902_v19  ;;  %1856 = vmatpush1.bf16.msra.mxu0 %v3009_v53  ;;  %v2967_v19 = vld [vmem:[#allocation6 + $0x12c] ss:$16 sps:$4 sm:$0xff]  }
  0x92   : > { %1857 = vmatprep.subr.bf16.mxu0 %v3010_v54 }
  0x94   : > { %936 = vmatpush1.bf16.msra.mxu1 %v2904_v20  ;;  %v3027_v20 = vld [vmem:[#allocation8 + $0xa0] ss:$8 sps:$4 sm:$0xff]  }
  0x95   : > { %937 = vmatprep.subr.bf16.mxu1 %v2905_v21  ;;  %1858 = vmatpush1.bf16.msra.mxu0 %v3012_v57  ;;  %v3028_v21 = vld [vmem:[#allocation8 + $0xb4] ss:$8 sps:$4 sm:$0xff]  }
  0x96   : > { %1859 = vmatprep.subr.bf16.mxu0 %v3013_v59 }
  0x98   : > { %938 = vmatpush1.bf16.msra.mxu1 %v2907_v22  ;;  %v2965_v22 = vld [vmem:[#allocation6 + $0x128] ss:$16 sps:$4 sm:$0xff]  }
  0x99   : > { %939 = vmatprep.subr.bf16.mxu1 %v2908_v23  ;;  %1860 = vmatpush1.bf16.msra.mxu0 %v3015_v63  ;;  %v2973_v23 = vld [vmem:[#allocation6 + $0x14c] ss:$16 sps:$4 sm:$0xff]  }
  0x9a   : > { %1861 = vmatprep.subr.bf16.mxu0 %v3016_v0 }
  0x9c   : > { %940 = vmatpush1.bf16.msra.mxu1 %v2910_v24  ;;  %v3030_v24 = vld [vmem:[#allocation8 + $0xb0] ss:$8 sps:$4 sm:$0xff]  }
  0x9d   : > { %941 = vmatprep.subr.bf16.mxu1 %v2911_v25  ;;  %1862 = vmatpush1.bf16.msra.mxu0 %v3018_v3  ;;  %v3600_v25 = vld [vmem:[%s3545_s8 + $0x50] ss:$8 sps:$4 sm:$0xff]  }
  0x9e   : > { %1863 = vmatprep.subr.bf16.mxu0 %v3019_v5 }
  0xa0   : > { %942 = vmatpush1.bf16.msra.mxu1 %v2913_v26  ;;  %v3031_v26 = vld [vmem:[#allocation8 + $0xc4] ss:$8 sps:$4 sm:$0xff]  }
  0xa1   : > { %943 = vmatprep.subr.bf16.mxu1 %v2914_v27  ;;  %1864 = vmatpush1.bf16.msra.mxu0 %v3021_v9  ;;  %v2971_v27 = vld [vmem:[#allocation6 + $0x148] ss:$16 sps:$4 sm:$0xff]  }
  0xa2   : > { %1865 = vmatprep.subr.bf16.mxu0 %v3022_v10 }
  0xa4   : > { %944 = vmatpush1.bf16.msra.mxu1 %v2916_v28  ;;  %v2977_v28 = vld [vmem:[%s3545_s8 + $0x64] ss:$8 sps:$4 sm:$0xff]  }
  0xa5   : > { %945 = vmatprep.subr.bf16.mxu1 %v2917_v29  ;;  %1866 = vmatpush1.bf16.msra.mxu0 %v3024_v14  ;;  %v2976_v29 = vld [vmem:[#allocation6 + $0x16c] ss:$16 sps:$4 sm:$0xff]   ;;  %v3043_v14 = vld [vmem:[#allocation8 + $0x100] ss:$8 sps:$4 sm:$0xff]  }
  0xa6   : > { %1867 = vmatprep.subr.bf16.mxu0 %v3025_v16 }
  0xa8   : > { %946 = vmatpush1.bf16.msra.mxu1 %v2919_v30  ;;  %v3033_v30 = vld [vmem:[#allocation8 + $0xc0] ss:$8 sps:$4 sm:$0xff]  }
  0xa9   : > { %947 = vmatprep.subr.bf16.mxu1 %v2920_v31  ;;  %1868 = vmatpush1.bf16.msra.mxu0 %v3027_v20  ;;  %v3034_v31 = vld [vmem:[#allocation8 + $0xd4] ss:$8 sps:$4 sm:$0xff]  }
  0xaa   : > { %1869 = vmatprep.subr.bf16.mxu0 %v3028_v21 }
  0xac   : > { %948 = vmatpush1.bf16.msra.mxu1 %v2922_v35  ;;  %v2980_v35 = vld [vmem:[#allocation6 + $0x188] ss:$16 sps:$4 sm:$0xff]  }
  0xad   : > { %1030 = vmatprep.subr.bf16.mxu1 %v2928_v36  ;;  %1870 = vmatpush1.bf16.msra.mxu0 %v3030_v24  ;;  %v2986_v36 = vld [vmem:[%s3545_s8 + $0x74] ss:$8 sps:$4 sm:$0xff]  }
  0xae   : > { %1871 = vmatprep.subr.bf16.mxu0 %v3031_v26 }
  0xaf   : > { %950 = vmatmul.mubr.bf16.vlgmr.msra.gmra.mrb[0].mxu1 %v3560_v38 }
  0xb0   : > { %1031 = vmatpush1.bf16.msra.mxu1 %v2926_v40  ;;  %959 = vmatprep.mubr.bf16.mxu1 %v3563_v41  ;;  %v2991_v40 = vld [vmem:[#allocation6 + $0x1cc] ss:$16 sps:$4 sm:$0xff]  }
  0xb1   : > { %1032 = vmatprep.subr.bf16.mxu1 %v2931_v42  ;;  %1872 = vmatpush1.bf16.msra.mxu0 %v3033_v30  ;;  %v2988_v42 = vld [vmem:[%s3545_s8 + $0x70] ss:$8 sps:$4 sm:$0xff]   ;;  %s3181_s8 = sshll.u32 %s3304_s19, 4  ;;  %s3182_s8 = int_to_ptr.vmem [resolvable:$false] %s3181_s8 }
  0xb2   : > { %1873 = vmatprep.subr.bf16.mxu0 %v3034_v31  ;;  %s3183_s29 = scalar_lea.vmem %s3182_s8, 8192  ;;  %p3184_p3 = scmp.lt.s32.totalorder %s3746_s15, %s3182_s8 }
  0xb3   : > { %p3185_p5 = scmp.lt.s32.totalorder %s3183_s29, %s3177_s18 }
  0xb4   : > { %1033 = vmatpush1.bf16.msra.mxu1 %v2929_v45  ;;  %v2992_v45 = vld [vmem:[#allocation6 + $0x1e8] ss:$16 sps:$4 sm:$0xff]  }
  0xb5   : > { %1034 = vmatprep.subr.bf16.mxu1 %v2937_v47  ;;  %v3036_v47 = vld [vmem:[#allocation8 + $0xd0] ss:$8 sps:$4 sm:$0xff]   ;;  %p3186_p9 = por %p3185_p5, %p3184_p3 }
  0xb6   : > { %1874 = vmatpush1.bf16.msra.mxu0 %v3036_v47 }
  0xb7   : > { %960 = vmatmul.mubr.bf16.gmra.mrb[4].mxu1 %v3568_v46  ;;  %p3187_p11 = pnand %p3186_p9, %p3180_p10 }
  0xb8   : > { %1035 = vmatpush1.bf16.msra.mxu1 %v2935_v48  ;;  %969 = vmatprep.mubr.bf16.mxu1 %v3571_v52  ;;  %v3037_v48 = vld [vmem:[#allocation8 + $0xe4] ss:$8 sps:$4 sm:$0xff]  }
  0xb9   : > { %1036 = vmatprep.subr.bf16.mxu1 %v2940_v50  ;;  %1875 = vmatprep.subr.bf16.mxu0 %v3037_v48  ;;  %v3052_v48 = vld [vmem:[#allocation8 + $0x130] ss:$8 sps:$4 sm:$0xff]  }
  0xba   : > { %1876 = vmatpush1.bf16.msra.mxu0 %v3039_v49 }
  0xbc   : > { %1037 = vmatpush1.bf16.msra.mxu1 %v2938_v55 }
  0xbd   : > { %1038 = vmatprep.subr.bf16.mxu1 %v2946_v56 }
  0xbf   : > { %970 = vmatmul.mubr.bf16.gmra.mrb[8].mxu1 %v3576_v58 }
  0xc0   : > { %1039 = vmatpush1.bf16.msra.mxu1 %v2944_v60  ;;  %979 = vmatprep.mubr.bf16.mxu1 %v3579_v61 }
  0xc1   : > { %1040 = vmatprep.subr.bf16.mxu1 %v2949_v62 }
  0xc4   : > { %1041 = vmatpush1.bf16.msra.mxu1 %v2947_v1 }
  0xc5   : > { %1042 = vmatprep.subr.bf16.mxu1 %v2955_v2 }
  0xc7   : > { %980 = vmatmul.mubr.bf16.gmra.mrb[12].mxu1 %v3584_v4 }
  0xc8   : > { %1043 = vmatpush1.bf16.msra.mxu1 %v2953_v6  ;;  %989 = vmatprep.mubr.bf16.mxu1 %v3587_v7 }
  0xc9   : > { %1044 = vmatprep.subr.bf16.mxu1 %v2958_v8 }
  0xcc   : > { %1045 = vmatpush1.bf16.msra.mxu1 %v2956_v11 }
  0xcd   : > { %1046 = vmatprep.subr.bf16.mxu1 %v2964_v12 }
  0xcf   : > { %990 = vmatmul.mubr.bf16.gmra.mrb[16].mxu1 %v3592_v15 }
  0xd0   : > { %1047 = vmatpush1.bf16.msra.mxu1 %v2962_v17  ;;  %999 = vmatprep.mubr.bf16.mxu1 %v3595_v18  ;;  %v3048_v17 = vld [vmem:[#allocation8 + $0x114] ss:$8 sps:$4 sm:$0xff]  }
  0xd1   : > { %1048 = vmatprep.subr.bf16.mxu1 %v2967_v19 }
  0xd4   : > { %1049 = vmatpush1.bf16.msra.mxu1 %v2965_v22 }
  0xd5   : > { %1050 = vmatprep.subr.bf16.mxu1 %v2973_v23 }
  0xd7   : > { %1000 = vmatmul.mubr.bf16.gmra.mrb[20].mxu1 %v3600_v25 }
  0xd8   : > { %1051 = vmatpush1.bf16.msra.mxu1 %v2971_v27  ;;  %1009 = vmatprep.mubr.bf16.mxu1 %v2977_v28  ;;  %v3051_v27 = vld [vmem:[#allocation8 + $0x124] ss:$8 sps:$4 sm:$0xff]  }
  0xd9   : > { %1052 = vmatprep.subr.bf16.mxu1 %v2976_v29 }
  0xdc   : > { %1053 = vmatpush1.bf16.msra.mxu1 %v2974_v32 }
  0xdd   : > { %1054 = vmatprep.subr.bf16.mxu1 %v2982_v33 }
  0xdf   : > { %1010 = vmatmul.mubr.bf16.gmra.mrb[24].mxu1 %v2979_v34 }
  0xe0   : > { %1055 = vmatpush1.bf16.msra.mxu1 %v2980_v35  ;;  %1019 = vmatprep.mubr.bf16.mxu1 %v2986_v36 }
  0xe1   : > { %1056 = vmatprep.subr.bf16.mxu1 %v2985_v37  ;;  %v3054_v37 = vld [vmem:[#allocation8 + $0x134] ss:$8 sps:$4 sm:$0xff]  }
  0xe4   : > { %1057 = vmatpush1.bf16.msra.mxu1 %v2983_v39 }
  0xe5   : > { %1058 = vmatprep.subr.bf16.mxu1 %v2991_v40 }
  0xe7   : > { %1020 = vmatmul.mubr.bf16.gmra.mrb[28].mxu1 %v2988_v42 }
  0xe8   : > { %1059 = vmatpush1.bf16.msra.mxu1 %v2989_v43  ;;  %1062 = vmatprep.mubr.bf16.mxu1 %v3556_v13  ;;  %v3040_v13 = vld [vmem:[#allocation8 + $0xf4] ss:$8 sps:$4 sm:$0xff]  }
  0xe9   : > { %1060 = vmatprep.subr.bf16.mxu1 %v2994_v44  ;;  %1877 = vmatprep.subr.bf16.mxu0 %v3040_v13  ;;  %v3057_v13 = vld [vmem:[#allocation8 + $0x144] ss:$8 sps:$4 sm:$0xff]  }
  0xec   : > { %1061 = vmatpush1.bf16.msra.mxu1 %v2992_v45 }
  0xef   : > { %1063 = vmatmul.mubr.bf16.vlgmr.msra.gmra.mrb[32].mxu1 %v3560_v38  ;;  %v3042_v38 = vld [vmem:[#allocation8 + $0xf0] ss:$8 sps:$4 sm:$0xff]  }
  0xf0   : > { %1072 = vmatprep.mubr.bf16.mxu1 %v3563_v41  ;;  %1878 = vmatpush1.bf16.msra.mxu0 %v3042_v38  ;;  %v3045_v41 = vld [vmem:[#allocation8 + $0x104] ss:$8 sps:$4 sm:$0xff]  }
  0xf1   : > { %1960 = vmatprep.subr.bf16.mxu0 %v3045_v41 }
  0xf7   : > { %1073 = vmatmul.mubr.bf16.gmra.mrb[36].mxu1 %v3568_v46  ;;  %v373_v46 = vlaneseq }
  0xf8   : > { %1082 = vmatprep.mubr.bf16.mxu1 %v3571_v52  ;;  %v495_v52 = vld [vmem:[%s3893_s2] sm:$0xf] }
  0xf9   : > { %v3619_v50 = vshrl.u32 %v373_v46, 7 }
  0xfb   : > { %v507_v51 = vsub.s32 2, %v3619_v50  ;;  %v511_v53 = vsub.s32 3, %v3619_v50  ;;  %v375_v56 = vsub.s32 0, %v3619_v50  ;;  %v379_v57 = vsub.s32 1, %v3619_v50 }
  0xfd   : > { %v3626_v54 = vrot.slane %v495_v52, %v507_v51  ;;  %v3628_v55 = vrot.slane %v495_v52, %v511_v53  ;;  %v3638_v59 = vrot.slane %v495_v52, %v379_v57 }
  0xff   : > { %1083 = vmatmul.mubr.bf16.gmra.mrb[40].mxu1 %v3576_v58  ;;  %v3634_v58 = vrot.slane %v495_v52, %v375_v56 }
 0x100   : > { %1092 = vmatprep.mubr.bf16.mxu1 %v3579_v61 }
 0x107   : > { %1093 = vmatmul.mubr.bf16.gmra.mrb[44].mxu1 %v3584_v4 }
 0x108   : > { %1102 = vmatprep.mubr.bf16.mxu1 %v3587_v7 }
 0x10f   : > { %1103 = vmatmul.mubr.bf16.gmra.mrb[48].mxu1 %v3592_v15 }
 0x110   : > { %1112 = vmatprep.mubr.bf16.mxu1 %v3595_v18 }
 0x117   : > { %1113 = vmatmul.mubr.bf16.gmra.mrb[52].mxu1 %v3600_v25  ;;  %v3046_v25 = vld [vmem:[#allocation8 + $0x110] ss:$8 sps:$4 sm:$0xff]  }
 0x118   : > { %1122 = vmatprep.mubr.bf16.mxu1 %v2977_v28 }
 0x11f   : > { %1123 = vmatmul.mubr.bf16.gmra.mrb[56].mxu1 %v2979_v34  ;;  %v3049_v34 = vld [vmem:[#allocation8 + $0x120] ss:$8 sps:$4 sm:$0xff]  }
 0x120   : > { %1132 = vmatprep.mubr.bf16.mxu1 %v2986_v36 }
 0x127   : > { %1133 = vmatmul.mubr.bf16.gmra.mrb[60].mxu1 %v2988_v42 }
 0x182   : > { %v951_v60 = vpop.f32.mrb[0].mxu1 }
 0x183   : > { %v952_v61 = vadd.f32 %v951_v60, %v3634_v58  ;;  %v953_v62 = vpop.f32.mrb[1].mxu1  ;;  %v3055_v60 = vld [vmem:[#allocation8 + $0x140] ss:$8 sps:$4 sm:$0xff]  }
 0x184   : > { %v954_v63 = vadd.f32 %v953_v62, %v3638_v59  ;;  %v955_v0 = vpop.f32.mrb[2].mxu1 }
 0x185   : > { %v1143_v1 = vmax.f32 %v952_v61, 0.0  ;;  %v956_v2 = vadd.f32 %v955_v0, %v3634_v58  ;;  %v957_v3 = vpop.f32.mrb[3].mxu1 }
 0x186   : > { %v1144_v4 = vmax.f32 %v954_v63, 0.0  ;;  %v958_v5 = vadd.f32 %v957_v3, %v3638_v59  ;;  %v3060_v63 = vld [vmem:[#allocation8 + $0x154] ss:$8 sps:$4 sm:$0xff]  }
 0x187   : > { %v1147_v6 = vmax.f32 %v956_v2, 0.0 }
 0x188   : > { %v2695_v7 = vpack.c.bf16 %v1144_v4, %v1143_v1  ;;  %v1148_v8 = vmax.f32 %v958_v5, 0.0 }
 0x189   : > { %v1207_v9 = vpack.c.bf16 %v1147_v6, %v1143_v1 }
 0x18a   : > { %1399 = vst [vmem:[%s3645_s10] sm:$0xff] %v2695_v7  ;;  %v2697_v10 = vpack.c.bf16 %v1148_v8, %v1147_v6  ;;  %v961_v11 = vpop.f32.mrb[4].mxu1  ;;  %v1208_v12 = vpack.c.bf16 %v1148_v8, %v1144_v4  ;;  %v3058_v7 = vld [vmem:[#allocation8 + $0x150] ss:$8 sps:$4 sm:$0xff]  }
 0x18b   : > { %v962_v15 = vadd.f32 %v961_v11, %v3634_v58  ;;  %v963_v16 = vpop.f32.mrb[5].mxu1 }
 0x18c   : > { %1401 = vst [vmem:[%s3645_s10 + $0x10] sm:$0xff] %v2697_v10  ;;  %v964_v18 = vadd.f32 %v963_v16, %v3638_v59  ;;  %v965_v19 = vpop.f32.mrb[6].mxu1  ;;  %1879 = vmatprep.mubr.bf16.mxu0 %v1208_v12 }
 0x18d   : > { %v1151_v20 = vmax.f32 %v962_v15, 0.0  ;;  %v966_v21 = vadd.f32 %v965_v19, %v3634_v58  ;;  %v967_v22 = vpop.f32.mrb[7].mxu1  ;;  %1880 = vmatmul.mubr.bf16.vlgmr.msra.gmra.mrb[0].mxu0 %v1207_v9  ;;  %v3063_v9 = vld [vmem:[#allocation8 + $0x164] ss:$8 sps:$4 sm:$0xff]  }
 0x18e   : > { %v1152_v23 = vmax.f32 %v964_v18, 0.0  ;;  %v968_v24 = vadd.f32 %v967_v22, %v3638_v59  ;;  %1961 = vmatpush1.bf16.msra.mxu0 %v3043_v14 }
 0x18f   : > { %v1155_v26 = vmax.f32 %v966_v21, 0.0  ;;  %1962 = vmatprep.subr.bf16.mxu0 %v3048_v17  ;;  %v3061_v17 = vld [vmem:[#allocation8 + $0x160] ss:$8 sps:$4 sm:$0xff]  }
 0x190   : > { %v2699_v28 = vpack.c.bf16 %v1152_v23, %v1151_v20  ;;  %v1156_v29 = vmax.f32 %v968_v24, 0.0 }
 0x191   : > { %v1211_v30 = vpack.c.bf16 %v1155_v26, %v1151_v20  ;;  %v3066_v20 = vld [vmem:[#allocation8 + $0x174] ss:$8 sps:$4 sm:$0xff]  }
 0x192   : > { %1403 = vst [vmem:[%s3645_s10 + $0x20] sm:$0xff] %v2699_v28  ;;  %v1212_v31 = vpack.c.bf16 %v1156_v29, %v1152_v23  ;;  %v2701_v32 = vpack.c.bf16 %v1156_v29, %v1155_v26  ;;  %v971_v33 = vpop.f32.mrb[8].mxu1  ;;  %1963 = vmatpush1.bf16.msra.mxu0 %v3046_v25  ;;  %v3064_v28 = vld [vmem:[#allocation8 + $0x170] ss:$8 sps:$4 sm:$0xff]  }
 0x193   : > { %v972_v35 = vadd.f32 %v971_v33, %v3634_v58  ;;  %v973_v36 = vpop.f32.mrb[9].mxu1  ;;  %1964 = vmatprep.subr.bf16.mxu0 %v3051_v27 }
 0x194   : > { %1405 = vst [vmem:[%s3645_s10 + $0x30] sm:$0xff] %v2701_v32  ;;  %v974_v39 = vadd.f32 %v973_v36, %v3638_v59  ;;  %v975_v40 = vpop.f32.mrb[10].mxu1  ;;  %1889 = vmatprep.mubr.bf16.mxu0 %v1212_v31 }
 0x195   : > { %v1159_v42 = vmax.f32 %v972_v35, 0.0  ;;  %v976_v43 = vadd.f32 %v975_v40, %v3634_v58  ;;  %v977_v44 = vpop.f32.mrb[11].mxu1  ;;  %1890 = vmatmul.mubr.bf16.gmra.mrb[4].mxu0 %v1211_v30  ;;  %v3069_v30 = vld [vmem:[#allocation8 + $0x184] ss:$8 sps:$4 sm:$0xff]  }
 0x196   : > { %v1160_v45 = vmax.f32 %v974_v39, 0.0  ;;  %v978_v47 = vadd.f32 %v977_v44, %v3638_v59  ;;  %1965 = vmatpush1.bf16.msra.mxu0 %v3049_v34 }
 0x197   : > { %v1163_v49 = vmax.f32 %v976_v43, 0.0  ;;  %1966 = vmatprep.subr.bf16.mxu0 %v3054_v37  ;;  %v3067_v37 = vld [vmem:[#allocation8 + $0x180] ss:$8 sps:$4 sm:$0xff]  }
 0x198   : > { %v2703_v38 = vpack.c.bf16 %v1160_v45, %v1159_v42  ;;  %v1164_v41 = vmax.f32 %v978_v47, 0.0 }
 0x199   : > { %v1215_v46 = vpack.c.bf16 %v1163_v49, %v1159_v42  ;;  %v3072_v42 = vld [vmem:[#allocation8 + $0x194] ss:$8 sps:$4 sm:$0xff]  }
 0x19a   : > { %1407 = vst [vmem:[%s3645_s10 + $0x40] sm:$0xff] %v2703_v38  ;;  %v1216_v51 = vpack.c.bf16 %v1164_v41, %v1160_v45  ;;  %v2705_v52 = vpack.c.bf16 %v1164_v41, %v1163_v49  ;;  %v981_v53 = vpop.f32.mrb[12].mxu1  ;;  %1967 = vmatpush1.bf16.msra.mxu0 %v3052_v48  ;;  %v3070_v38 = vld [vmem:[#allocation8 + $0x190] ss:$8 sps:$4 sm:$0xff]  }
 0x19b   : > { %v982_v61 = vadd.f32 %v981_v53, %v3634_v58  ;;  %v983_v62 = vpop.f32.mrb[13].mxu1  ;;  %1968 = vmatprep.subr.bf16.mxu0 %v3057_v13 }
 0x19c   : > { %1409 = vst [vmem:[%s3645_s10 + $0x50] sm:$0xff] %v2705_v52  ;;  %v984_v0 = vadd.f32 %v983_v62, %v3638_v59  ;;  %v985_v1 = vpop.f32.mrb[14].mxu1  ;;  %1899 = vmatprep.mubr.bf16.mxu0 %v1216_v51 }
 0x19d   : > { %v1167_v2 = vmax.f32 %v982_v61, 0.0  ;;  %v986_v3 = vadd.f32 %v985_v1, %v3634_v58  ;;  %v987_v4 = vpop.f32.mrb[15].mxu1  ;;  %1900 = vmatmul.mubr.bf16.gmra.mrb[8].mxu0 %v1215_v46  ;;  %v3075_v46 = vld [vmem:[#allocation8 + $0x1a4] ss:$8 sps:$4 sm:$0xff]  }
 0x19e   : > { %v1168_v5 = vmax.f32 %v984_v0, 0.0  ;;  %v988_v6 = vadd.f32 %v987_v4, %v3638_v59  ;;  %1969 = vmatpush1.bf16.msra.mxu0 %v3055_v60 }
 0x19f   : > { %v1171_v8 = vmax.f32 %v986_v3, 0.0  ;;  %1970 = vmatprep.subr.bf16.mxu0 %v3060_v63  ;;  %v3073_v63 = vld [vmem:[#allocation8 + $0x1a0] ss:$8 sps:$4 sm:$0xff]  }
 0x1a0   : > { %v2707_v10 = vpack.c.bf16 %v1168_v5, %v1167_v2  ;;  %v1172_v11 = vmax.f32 %v988_v6, 0.0 }
 0x1a1   : > { %v1219_v12 = vpack.c.bf16 %v1171_v8, %v1167_v2  ;;  %v3078_v2 = vld [vmem:[#allocation8 + $0x1b4] ss:$8 sps:$4 sm:$0xff]  }
 0x1a2   : > { %1411 = vst [vmem:[%s3645_s10 + $0x60] sm:$0xff] %v2707_v10  ;;  %v1220_v14 = vpack.c.bf16 %v1172_v11, %v1168_v5  ;;  %v2709_v15 = vpack.c.bf16 %v1172_v11, %v1171_v8  ;;  %v991_v16 = vpop.f32.mrb[16].mxu1  ;;  %1971 = vmatpush1.bf16.msra.mxu0 %v3058_v7  ;;  %v3076_v10 = vld [vmem:[#allocation8 + $0x1b0] ss:$8 sps:$4 sm:$0xff]  }
 0x1a3   : > { %v992_v18 = vadd.f32 %v991_v16, %v3634_v58  ;;  %v993_v19 = vpop.f32.mrb[17].mxu1  ;;  %1972 = vmatprep.subr.bf16.mxu0 %v3063_v9 }
 0x1a4   : > { %1413 = vst [vmem:[%s3645_s10 + $0x70] sm:$0xff] %v2709_v15  ;;  %v994_v21 = vadd.f32 %v993_v19, %v3638_v59  ;;  %v995_v22 = vpop.f32.mrb[18].mxu1  ;;  %1909 = vmatprep.mubr.bf16.mxu0 %v1220_v14 }
 0x1a5   : > { %v1175_v23 = vmax.f32 %v992_v18, 0.0  ;;  %v996_v24 = vadd.f32 %v995_v22, %v3634_v58  ;;  %v997_v25 = vpop.f32.mrb[19].mxu1  ;;  %1910 = vmatmul.mubr.bf16.gmra.mrb[12].mxu0 %v1219_v12  ;;  %v3081_v12 = vld [vmem:[#allocation8 + $0x1c4] ss:$8 sps:$4 sm:$0xff]  }
 0x1a6   : > { %v1176_v26 = vmax.f32 %v994_v21, 0.0  ;;  %v998_v27 = vadd.f32 %v997_v25, %v3638_v59  ;;  %1973 = vmatpush1.bf16.msra.mxu0 %v3061_v17 }
 0x1a7   : > { %v1179_v29 = vmax.f32 %v996_v24, 0.0  ;;  %1974 = vmatprep.subr.bf16.mxu0 %v3066_v20  ;;  %v3079_v20 = vld [vmem:[#allocation8 + $0x1c0] ss:$8 sps:$4 sm:$0xff]  }
 0x1a8   : > { %v2711_v31 = vpack.c.bf16 %v1176_v26, %v1175_v23  ;;  %v1180_v32 = vmax.f32 %v998_v27, 0.0 }
 0x1a9   : > { %v1223_v33 = vpack.c.bf16 %v1179_v29, %v1175_v23  ;;  %v3084_v23 = vld [vmem:[#allocation8 + $0x1d4] ss:$8 sps:$4 sm:$0xff]  }
 0x1aa   : > { %1415 = vst [vmem:[%s3645_s10 + $0x80] sm:$0xff] %v2711_v31  ;;  %v1224_v34 = vpack.c.bf16 %v1180_v32, %v1176_v26  ;;  %v2713_v35 = vpack.c.bf16 %v1180_v32, %v1179_v29  ;;  %v1001_v36 = vpop.f32.mrb[20].mxu1  ;;  %1975 = vmatpush1.bf16.msra.mxu0 %v3064_v28  ;;  %v3082_v31 = vld [vmem:[#allocation8 + $0x1d0] ss:$8 sps:$4 sm:$0xff]  }
 0x1ab   : > { %v1002_v39 = vadd.f32 %v1001_v36, %v3634_v58  ;;  %v1003_v40 = vpop.f32.mrb[21].mxu1  ;;  %1976 = vmatprep.subr.bf16.mxu0 %v3069_v30 }
 0x1ac   : > { %1417 = vst [vmem:[%s3645_s10 + $0x90] sm:$0xff] %v2713_v35  ;;  %v1004_v43 = vadd.f32 %v1003_v40, %v3638_v59  ;;  %v1005_v44 = vpop.f32.mrb[22].mxu1  ;;  %1919 = vmatprep.mubr.bf16.mxu0 %v1224_v34 }
 0x1ad   : > { %v1183_v45 = vmax.f32 %v1002_v39, 0.0  ;;  %v1006_v47 = vadd.f32 %v1005_v44, %v3634_v58  ;;  %v1007_v48 = vpop.f32.mrb[23].mxu1  ;;  %1920 = vmatmul.mubr.bf16.gmra.mrb[16].mxu0 %v1223_v33  ;;  %v3087_v33 = vld [vmem:[#allocation8 + $0x1e4] ss:$8 sps:$4 sm:$0xff]  }
 0x1ae   : > { %v1184_v49 = vmax.f32 %v1004_v43, 0.0  ;;  %v1008_v13 = vadd.f32 %v1007_v48, %v3638_v59  ;;  %1977 = vmatpush1.bf16.msra.mxu0 %v3067_v37 }
 0x1af   : > { %v1187_v41 = vmax.f32 %v1006_v47, 0.0  ;;  %1978 = vmatprep.subr.bf16.mxu0 %v3072_v42 }
 0x1b0   : > { %v2715_v51 = vpack.c.bf16 %v1184_v49, %v1183_v45  ;;  %v1188_v52 = vmax.f32 %v1008_v13, 0.0 }
 0x1b1   : > { %v1227_v53 = vpack.c.bf16 %v1187_v41, %v1183_v45 }
 0x1b2   : > { %1419 = vst [vmem:[%s3645_s10 + $0xa0] sm:$0xff] %v2715_v51  ;;  %v1228_v60 = vpack.c.bf16 %v1188_v52, %v1184_v49  ;;  %v2717_v61 = vpack.c.bf16 %v1188_v52, %v1187_v41  ;;  %v1011_v62 = vpop.f32.mrb[24].mxu1  ;;  %1979 = vmatpush1.bf16.msra.mxu0 %v3070_v38  ;;  %v3088_v41 = vld [vmem:[#allocation8 + $0x1f0] ss:$8 sps:$4 sm:$0xff]  }
 0x1b3   : > { %v1012_v0 = vadd.f32 %v1011_v62, %v3634_v58  ;;  %v1013_v1 = vpop.f32.mrb[25].mxu1  ;;  %1980 = vmatprep.subr.bf16.mxu0 %v3075_v46 }
 0x1b4   : > { %1421 = vst [vmem:[%s3645_s10 + $0xb0] sm:$0xff] %v2717_v61  ;;  %v1014_v3 = vadd.f32 %v1013_v1, %v3638_v59  ;;  %v1015_v4 = vpop.f32.mrb[26].mxu1  ;;  %1929 = vmatprep.mubr.bf16.mxu0 %v1228_v60 }
 0x1b5   : > { %v1191_v5 = vmax.f32 %v1012_v0, 0.0  ;;  %v1016_v6 = vadd.f32 %v1015_v4, %v3634_v58  ;;  %v1017_v7 = vpop.f32.mrb[27].mxu1  ;;  %1930 = vmatmul.mubr.bf16.gmra.mrb[20].mxu0 %v1227_v53 }
 0x1b6   : > { %v1192_v8 = vmax.f32 %v1014_v3, 0.0  ;;  %v1018_v9 = vadd.f32 %v1017_v7, %v3638_v59  ;;  %1981 = vmatpush1.bf16.msra.mxu0 %v3073_v63 }
 0x1b7   : > { %v1195_v11 = vmax.f32 %v1016_v6, 0.0  ;;  %1982 = vmatprep.subr.bf16.mxu0 %v3078_v2 }
 0x1b8   : > { %v2719_v14 = vpack.c.bf16 %v1192_v8, %v1191_v5  ;;  %v1196_v15 = vmax.f32 %v1018_v9, 0.0 }
 0x1b9   : > { %v1231_v16 = vpack.c.bf16 %v1195_v11, %v1191_v5 }
 0x1ba   : > { %1423 = vst [vmem:[%s3645_s10 + $0xc0] sm:$0xff] %v2719_v14  ;;  %v1232_v17 = vpack.c.bf16 %v1196_v15, %v1192_v8  ;;  %v2721_v18 = vpack.c.bf16 %v1196_v15, %v1195_v11  ;;  %v1021_v19 = vpop.f32.mrb[28].mxu1  ;;  %1983 = vmatpush1.bf16.msra.mxu0 %v3076_v10 }
 0x1bb   : > { %v1022_v21 = vadd.f32 %v1021_v19, %v3634_v58  ;;  %v1023_v22 = vpop.f32.mrb[29].mxu1  ;;  %1984 = vmatprep.subr.bf16.mxu0 %v3081_v12 }
 0x1bc   : > { %1425 = vst [vmem:[%s3645_s10 + $0xd0] sm:$0xff] %v2721_v18  ;;  %v1024_v24 = vadd.f32 %v1023_v22, %v3638_v59  ;;  %v1025_v25 = vpop.f32.mrb[30].mxu1  ;;  %1939 = vmatprep.mubr.bf16.mxu0 %v1232_v17 }
 0x1bd   : > { %v1199_v26 = vmax.f32 %v1022_v21, 0.0  ;;  %v1026_v27 = vadd.f32 %v1025_v25, %v3634_v58  ;;  %v1027_v28 = vpop.f32.mrb[31].mxu1  ;;  %1940 = vmatmul.mubr.bf16.gmra.mrb[24].mxu0 %v1231_v16  ;;  %v3085_v58 = vld [vmem:[#allocation8 + $0x1e0] ss:$8 sps:$4 sm:$0xff]  }
 0x1be   : > { %v1200_v29 = vmax.f32 %v1024_v24, 0.0  ;;  %v1028_v30 = vadd.f32 %v1027_v28, %v3638_v59  ;;  %1985 = vmatpush1.bf16.msra.mxu0 %v3079_v20  ;;  %v3090_v59 = vld [vmem:[#allocation8 + $0x1f4] ss:$8 sps:$4 sm:$0xff]  }
 0x1bf   : > { %v1203_v32 = vmax.f32 %v1026_v27, 0.0  ;;  %1986 = vmatprep.subr.bf16.mxu0 %v3084_v23 }
 0x1c0   : > { %v2723_v34 = vpack.c.bf16 %v1200_v29, %v1199_v26  ;;  %v1204_v35 = vmax.f32 %v1028_v30, 0.0 }
 0x1c1   : > { %v1235_v36 = vpack.c.bf16 %v1203_v32, %v1199_v26 }
 0x1c2   : > { %1427 = vst [vmem:[%s3645_s10 + $0xe0] sm:$0xff] %v2723_v34  ;;  %v1236_v37 = vpack.c.bf16 %v1204_v35, %v1200_v29  ;;  %v2725_v39 = vpack.c.bf16 %v1204_v35, %v1203_v32  ;;  %v1064_v40 = vpop.f32.mrb[32].mxu1  ;;  %1987 = vmatpush1.bf16.msra.mxu0 %v3082_v31 }
 0x1c3   : > { %v1065_v42 = vadd.f32 %v1064_v40, %v3626_v54  ;;  %v1066_v43 = vpop.f32.mrb[33].mxu1  ;;  %1988 = vmatprep.subr.bf16.mxu0 %v3087_v33 }
 0x1c4   : > { %1429 = vst [vmem:[%s3645_s10 + $0xf0] sm:$0xff] %v2725_v39  ;;  %v1067_v44 = vadd.f32 %v1066_v43, %v3628_v55  ;;  %v1068_v45 = vpop.f32.mrb[34].mxu1  ;;  %1949 = vmatprep.mubr.bf16.mxu0 %v1236_v37 }
 0x1c5   : > { %v1145_v47 = vmax.f32 %v1065_v42, 0.0  ;;  %v1069_v48 = vadd.f32 %v1068_v45, %v3626_v54  ;;  %v1070_v49 = vpop.f32.mrb[35].mxu1  ;;  %1950 = vmatmul.mubr.bf16.gmra.mrb[28].mxu0 %v1235_v36 }
 0x1c6   : > { %v1146_v13 = vmax.f32 %v1067_v44, 0.0  ;;  %v1071_v38 = vadd.f32 %v1070_v49, %v3628_v55  ;;  %1989 = vmatpush1.bf16.msra.mxu0 %v3085_v58 }
 0x1c7   : > { %v1149_v46 = vmax.f32 %v1069_v48, 0.0  ;;  %1990 = vmatprep.subr.bf16.mxu0 %v3090_v59 }
 0x1c8   : > { %v2696_v51 = vpack.c.bf16 %v1146_v13, %v1145_v47  ;;  %v1150_v52 = vmax.f32 %v1071_v38, 0.0 }
 0x1c9   : > { %v1209_v53 = vpack.c.bf16 %v1149_v46, %v1145_v47 }
 0x1ca   : > { %1400 = vst [vmem:[%s3645_s10 + $0x8] sm:$0xff] %v2696_v51  ;;  %v1210_v60 = vpack.c.bf16 %v1150_v52, %v1146_v13  ;;  %v2698_v61 = vpack.c.bf16 %v1150_v52, %v1149_v46  ;;  %v1074_v62 = vpop.f32.mrb[36].mxu1  ;;  %1991 = vmatpush1.bf16.msra.mxu0 %v3088_v41 }
 0x1cb   : > { %v1075_v63 = vadd.f32 %v1074_v62, %v3626_v54  ;;  %v1076_v0 = vpop.f32.mrb[37].mxu1 }
 0x1cc   : > { %1402 = vst [vmem:[%s3645_s10 + $0x18] sm:$0xff] %v2698_v61  ;;  %v1077_v1 = vadd.f32 %v1076_v0, %v3628_v55  ;;  %v1078_v2 = vpop.f32.mrb[38].mxu1  ;;  %1992 = vmatprep.mubr.bf16.mxu0 %v1210_v60 }
 0x1cd   : > { %v1153_v3 = vmax.f32 %v1075_v63, 0.0  ;;  %v1079_v4 = vadd.f32 %v1078_v2, %v3626_v54  ;;  %v1080_v5 = vpop.f32.mrb[39].mxu1  ;;  %1993 = vmatmul.mubr.bf16.vlgmr.msra.gmra.mrb[0].mxu0 %v1209_v53 }
 0x1ce   : > { %v1154_v6 = vmax.f32 %v1077_v1, 0.0  ;;  %v1081_v7 = vadd.f32 %v1080_v5, %v3628_v55 }
 0x1cf   : > { %v1157_v8 = vmax.f32 %v1079_v4, 0.0 }
 0x1d0   : > { %v2700_v9 = vpack.c.bf16 %v1154_v6, %v1153_v3  ;;  %v1158_v10 = vmax.f32 %v1081_v7, 0.0 }
 0x1d1   : > { %v1213_v11 = vpack.c.bf16 %v1157_v8, %v1153_v3 }
 0x1d2   : > { %1404 = vst [vmem:[%s3645_s10 + $0x28] sm:$0xff] %v2700_v9  ;;  %v1214_v12 = vpack.c.bf16 %v1158_v10, %v1154_v6  ;;  %v2702_v14 = vpack.c.bf16 %v1158_v10, %v1157_v8  ;;  %v1084_v15 = vpop.f32.mrb[40].mxu1 }
 0x1d3   : > { %v1085_v16 = vadd.f32 %v1084_v15, %v3626_v54  ;;  %v1086_v17 = vpop.f32.mrb[41].mxu1 }
 0x1d4   : > { %1406 = vst [vmem:[%s3645_s10 + $0x38] sm:$0xff] %v2702_v14  ;;  %v1087_v18 = vadd.f32 %v1086_v17, %v3628_v55  ;;  %v1088_v19 = vpop.f32.mrb[42].mxu1  ;;  %2002 = vmatprep.mubr.bf16.mxu0 %v1214_v12 }
 0x1d5   : > { %v1161_v20 = vmax.f32 %v1085_v16, 0.0  ;;  %v1089_v21 = vadd.f32 %v1088_v19, %v3626_v54  ;;  %v1090_v22 = vpop.f32.mrb[43].mxu1  ;;  %2003 = vmatmul.mubr.bf16.gmra.mrb[4].mxu0 %v1213_v11 }
 0x1d6   : > { %v1162_v23 = vmax.f32 %v1087_v18, 0.0  ;;  %v1091_v24 = vadd.f32 %v1090_v22, %v3628_v55 }
 0x1d7   : > { %v1165_v25 = vmax.f32 %v1089_v21, 0.0 }
 0x1d8   : > { %v2704_v26 = vpack.c.bf16 %v1162_v23, %v1161_v20  ;;  %v1166_v27 = vmax.f32 %v1091_v24, 0.0 }
 0x1d9   : > { %v1217_v28 = vpack.c.bf16 %v1165_v25, %v1161_v20 }
 0x1da   : > { %1408 = vst [vmem:[%s3645_s10 + $0x48] sm:$0xff] %v2704_v26  ;;  %v1218_v29 = vpack.c.bf16 %v1166_v27, %v1162_v23  ;;  %v2706_v30 = vpack.c.bf16 %v1166_v27, %v1165_v25  ;;  %v1094_v31 = vpop.f32.mrb[44].mxu1 }
 0x1db   : > { %v1095_v32 = vadd.f32 %v1094_v31, %v3626_v54  ;;  %v1096_v33 = vpop.f32.mrb[45].mxu1 }
 0x1dc   : > { %1410 = vst [vmem:[%s3645_s10 + $0x58] sm:$0xff] %v2706_v30  ;;  %v1097_v34 = vadd.f32 %v1096_v33, %v3628_v55  ;;  %v1098_v35 = vpop.f32.mrb[46].mxu1  ;;  %2012 = vmatprep.mubr.bf16.mxu0 %v1218_v29 }
 0x1dd   : > { %v1169_v36 = vmax.f32 %v1095_v32, 0.0  ;;  %v1099_v37 = vadd.f32 %v1098_v35, %v3626_v54  ;;  %v1100_v39 = vpop.f32.mrb[47].mxu1  ;;  %2013 = vmatmul.mubr.bf16.gmra.mrb[8].mxu0 %v1217_v28 }
 0x1de   : > { %v1170_v40 = vmax.f32 %v1097_v34, 0.0  ;;  %v1101_v58 = vadd.f32 %v1100_v39, %v3628_v55 }
 0x1df   : > { %v1173_v42 = vmax.f32 %v1099_v37, 0.0 }
 0x1e0   : > { %v2708_v43 = vpack.c.bf16 %v1170_v40, %v1169_v36  ;;  %v1174_v59 = vmax.f32 %v1101_v58, 0.0 }
 0x1e1   : > { %v1221_v44 = vpack.c.bf16 %v1173_v42, %v1169_v36 }
 0x1e2   : > { %1412 = vst [vmem:[%s3645_s10 + $0x68] sm:$0xff] %v2708_v43  ;;  %v1222_v45 = vpack.c.bf16 %v1174_v59, %v1170_v40  ;;  %v2710_v47 = vpack.c.bf16 %v1174_v59, %v1173_v42  ;;  %v1104_v48 = vpop.f32.mrb[48].mxu1 }
 0x1e3   : > { %v1105_v49 = vadd.f32 %v1104_v48, %v3626_v54  ;;  %v1106_v13 = vpop.f32.mrb[49].mxu1 }
 0x1e4   : > { %1414 = vst [vmem:[%s3645_s10 + $0x78] sm:$0xff] %v2710_v47  ;;  %v1107_v38 = vadd.f32 %v1106_v13, %v3628_v55  ;;  %v1108_v41 = vpop.f32.mrb[50].mxu1  ;;  %2022 = vmatprep.mubr.bf16.mxu0 %v1222_v45 }
 0x1e5   : > { %v1177_v46 = vmax.f32 %v1105_v49, 0.0  ;;  %v1109_v51 = vadd.f32 %v1108_v41, %v3626_v54  ;;  %v1110_v52 = vpop.f32.mrb[51].mxu1  ;;  %2023 = vmatmul.mubr.bf16.gmra.mrb[12].mxu0 %v1221_v44 }
 0x1e6   : > { %v1178_v53 = vmax.f32 %v1107_v38, 0.0  ;;  %v1111_v60 = vadd.f32 %v1110_v52, %v3628_v55 }
 0x1e7   : > { %v1181_v61 = vmax.f32 %v1109_v51, 0.0 }
 0x1e8   : > { %v2712_v62 = vpack.c.bf16 %v1178_v53, %v1177_v46  ;;  %v1182_v63 = vmax.f32 %v1111_v60, 0.0 }
 0x1e9   : > { %v1225_v0 = vpack.c.bf16 %v1181_v61, %v1177_v46 }
 0x1ea   : > { %1416 = vst [vmem:[%s3645_s10 + $0x88] sm:$0xff] %v2712_v62  ;;  %v1226_v1 = vpack.c.bf16 %v1182_v63, %v1178_v53  ;;  %v2714_v2 = vpack.c.bf16 %v1182_v63, %v1181_v61  ;;  %v1114_v3 = vpop.f32.mrb[52].mxu1 }
 0x1eb   : > { %v1115_v4 = vadd.f32 %v1114_v3, %v3626_v54  ;;  %v1116_v5 = vpop.f32.mrb[53].mxu1 }
 0x1ec   : > { %1418 = vst [vmem:[%s3645_s10 + $0x98] sm:$0xff] %v2714_v2  ;;  %v1117_v6 = vadd.f32 %v1116_v5, %v3628_v55  ;;  %v1118_v7 = vpop.f32.mrb[54].mxu1  ;;  %2032 = vmatprep.mubr.bf16.mxu0 %v1226_v1 }
 0x1ed   : > { %v1185_v8 = vmax.f32 %v1115_v4, 0.0  ;;  %v1119_v9 = vadd.f32 %v1118_v7, %v3626_v54  ;;  %v1120_v10 = vpop.f32.mrb[55].mxu1  ;;  %2033 = vmatmul.mubr.bf16.gmra.mrb[16].mxu0 %v1225_v0 }
 0x1ee   : > { %v1186_v11 = vmax.f32 %v1117_v6, 0.0  ;;  %v1121_v12 = vadd.f32 %v1120_v10, %v3628_v55 }
 0x1ef   : > { %v1189_v14 = vmax.f32 %v1119_v9, 0.0 }
 0x1f0   : > { %v2716_v15 = vpack.c.bf16 %v1186_v11, %v1185_v8  ;;  %v1190_v16 = vmax.f32 %v1121_v12, 0.0 }
 0x1f1   : > { %v1229_v17 = vpack.c.bf16 %v1189_v14, %v1185_v8 }
 0x1f2   : > { %1420 = vst [vmem:[%s3645_s10 + $0xa8] sm:$0xff] %v2716_v15  ;;  %v1230_v18 = vpack.c.bf16 %v1190_v16, %v1186_v11  ;;  %v2718_v19 = vpack.c.bf16 %v1190_v16, %v1189_v14  ;;  %v1124_v20 = vpop.f32.mrb[56].mxu1 }
 0x1f3   : > { %v1125_v21 = vadd.f32 %v1124_v20, %v3626_v54  ;;  %v1126_v22 = vpop.f32.mrb[57].mxu1 }
 0x1f4   : > { %1422 = vst [vmem:[%s3645_s10 + $0xb8] sm:$0xff] %v2718_v19  ;;  %v1127_v23 = vadd.f32 %v1126_v22, %v3628_v55  ;;  %v1128_v24 = vpop.f32.mrb[58].mxu1  ;;  %2042 = vmatprep.mubr.bf16.mxu0 %v1230_v18 }
 0x1f5   : > { %v1193_v25 = vmax.f32 %v1125_v21, 0.0  ;;  %v1129_v26 = vadd.f32 %v1128_v24, %v3626_v54  ;;  %v1130_v27 = vpop.f32.mrb[59].mxu1  ;;  %2043 = vmatmul.mubr.bf16.gmra.mrb[20].mxu0 %v1229_v17 }
 0x1f6   : > { %v1194_v28 = vmax.f32 %v1127_v23, 0.0  ;;  %v1131_v29 = vadd.f32 %v1130_v27, %v3628_v55 }
 0x1f7   : > { %v1197_v30 = vmax.f32 %v1129_v26, 0.0 }
 0x1f8   : > { %v2720_v31 = vpack.c.bf16 %v1194_v28, %v1193_v25  ;;  %v1198_v32 = vmax.f32 %v1131_v29, 0.0 }
 0x1f9   : > { %v1233_v33 = vpack.c.bf16 %v1197_v30, %v1193_v25 }
 0x1fa   : > { %1424 = vst [vmem:[%s3645_s10 + $0xc8] sm:$0xff] %v2720_v31  ;;  %v1234_v34 = vpack.c.bf16 %v1198_v32, %v1194_v28  ;;  %v2722_v35 = vpack.c.bf16 %v1198_v32, %v1197_v30  ;;  %v1134_v36 = vpop.f32.mrb[60].mxu1 }
 0x1fb   : > { %v1135_v37 = vadd.f32 %v1134_v36, %v3626_v54  ;;  %v1136_v39 = vpop.f32.mrb[61].mxu1 }
 0x1fc   : > { %1426 = vst [vmem:[%s3645_s10 + $0xd8] sm:$0xff] %v2722_v35  ;;  %v1137_v40 = vadd.f32 %v1136_v39, %v3628_v55  ;;  %v1138_v58 = vpop.f32.mrb[62].mxu1  ;;  %2052 = vmatprep.mubr.bf16.mxu0 %v1234_v34 }
 0x1fd   : > { %v1201_v42 = vmax.f32 %v1135_v37, 0.0  ;;  %v1139_v43 = vadd.f32 %v1138_v58, %v3626_v54  ;;  %v1140_v59 = vpop.f32.mrb[63].mxu1  ;;  %2053 = vmatmul.mubr.bf16.gmra.mrb[24].mxu0 %v1233_v33 }
 0x1fe   : > { %v1202_v44 = vmax.f32 %v1137_v40, 0.0  ;;  %v1141_v45 = vadd.f32 %v1140_v59, %v3628_v55 }
 0x1ff   : > { %v1205_v47 = vmax.f32 %v1139_v43, 0.0 }
 0x200   : > { %v2724_v48 = vpack.c.bf16 %v1202_v44, %v1201_v42  ;;  %v1206_v49 = vmax.f32 %v1141_v45, 0.0 }
 0x201   : > { %v1237_v13 = vpack.c.bf16 %v1205_v47, %v1201_v42 }
 0x202   : > { %1428 = vst [vmem:[%s3645_s10 + $0xe8] sm:$0xff] %v2724_v48  ;;  %v1238_v38 = vpack.c.bf16 %v1206_v49, %v1202_v44  ;;  %v2726_v41 = vpack.c.bf16 %v1206_v49, %v1205_v47 }
 0x204   : > { %1430 = vst [vmem:[%s3645_s10 + $0xf8] sm:$0xff] %v2726_v41  ;;  %2062 = vmatprep.mubr.bf16.mxu0 %v1238_v38 }
 0x205   : > { %2063 = vmatmul.mubr.bf16.gmra.mrb[28].mxu0 %v1237_v13 }
 0x206   : > { %3190 = shalt.err (!%p3187_p11)
}
 0x207   : > { %s3191_s7 = scalar_lea.hbm %s3744_s20, 4096  ;;  %s3195_s13 = scalar_lea.hbm %s3897_s6, 8192 }
 0x208   : > { %p3192_p0 = scmp.ne.s32.totalorder %s3744_s20, %s3191_s7  ;;  %p3196_p6 = scmp.lt.u32.totalorder %s3744_s20, %s3897_s6 }
 0x209   : > { %p3197_p7 = scmp.lt.u32.totalorder %s3195_s13, %s3191_s7  ;;  %p3199_p8 = scmp.lt.u32.totalorder %s3191_s7, %s3744_s20 }
 0x20a   : > { %p3193_p4 = pnand %p3192_p0, %p3916_p12 }
 0x20b   : > { %p3198_p2 = por %p3197_p7, %p3196_p6 }
 0x20c   : > { %p3194_p13 = pneg %p3193_p4 }
 0x20d   : > { %p3200_p1 = por %p3199_p8, %p3198_p2 }
 0x20f   : > { %p3201_p10 = pnand %p3200_p1, %p3194_p13 }
 0x211   : > { %3204 = shalt.err (!%p3201_p10)
}
 0x212   : > { %s3305_s18 = smov 256   ;;  %s3306_s19 = smov 16   ;;  %v371_v54 = vld [vmem:[%s3895_s4] sm:$0x3] }
 0x213   : > { %2790 = dma.vmem_to_hbm [thread:$0]  (%p3916_p12), %s3746_s15, 4096, %s3744_s20, %s2290_s11, %s3305_s18, %s3305_s18, %s3306_s19   ;;  %v3777_v55 = vrot.slane %v371_v54, %v375_v56  ;;  %v3781_v46 = vrot.slane %v371_v54, %v379_v57 }
 0x214   : > { %s3789_s15 = scalar_lea.vmem [#allocation9], %s2486_s30  ;;  %s2744_s30 = sshll.u32 %s3287_s24, 11 }
 0x215   : > { %s2304_s20 = sshll.u32 %s3789_s15, 4  ;;  %s3838_s9 = scalar_lea.hbm %s3896_s5, %s2744_s30  ;;  %s3840_s20 = int_to_ptr.vmem [resolvable:$true] %s2304_s20 }
 0x216   : > { %s2285_s24 = scalar_lea.sflag [#allocation5], %s3539_s28  ;;  %s3205_s10 = scalar_lea.vmem %s3840_s20, 2048 }
 0x217   : > { %p3206_p3 = scmp.ne.s32.totalorder %s3840_s20, %s3205_s10  ;;  %s3307_s13 = smov [#allocation9]  }
 0x218   : > { %s3209_s17 = sshll.u32 %s3307_s13, 4  ;;  %s3210_s17 = int_to_ptr.vmem [resolvable:$false] %s3209_s17 }
 0x219   : > { %p3207_p5 = pnand %p3206_p3, %p3916_p12  ;;  %s3211_s14 = scalar_lea.vmem %s3210_s17, 4096 }
 0x21a   : > { %p3212_p11 = scmp.lt.s32.totalorder %s3840_s20, %s3210_s17  ;;  %p3213_p0 = scmp.lt.s32.totalorder %s3211_s14, %s3205_s10 }
 0x21b   : > { %p3208_p9 = pneg %p3207_p5 }
 0x21c   : > { %p3214_p4 = por %p3213_p0, %p3212_p11 }
 0x21e   : > { %p3215_p13 = pnand %p3214_p4, %p3208_p9 }
 0x2a0   : > { %v1994_v51 = vpop.f32.mrb[0].mxu0 }
 0x2a1   : > { %v2073_v52 = vadd.f32 %v1994_v51, %v3777_v55  ;;  %v1996_v53 = vpop.f32.mrb[1].mxu0 }
 0x2a2   : > { %v2074_v60 = vadd.f32 %v1996_v53, %v3781_v46  ;;  %v1998_v61 = vpop.f32.mrb[2].mxu0 }
 0x2a3   : > { %v2075_v62 = vadd.f32 %v1998_v61, %v3777_v55  ;;  %v2000_v63 = vpop.f32.mrb[3].mxu0 }
 0x2a4   : > { %v2727_v0 = vpack.c.bf16 %v2074_v60, %v2073_v52  ;;  %v2076_v1 = vadd.f32 %v2000_v63, %v3781_v46 }
 0x2a6   : > { %2268 = vst [vmem:[%s3789_s15] sm:$0xff] %v2727_v0  ;;  %v2728_v50 = vpack.c.bf16 %v2076_v1, %v2075_v62 }
 0x2a8   : > { %2269 = vst [vmem:[%s3789_s15 + $0x8] sm:$0xff] %v2728_v50  ;;  %v2004_v56 = vpop.f32.mrb[4].mxu0 }
 0x2a9   : > { %v2077_v57 = vadd.f32 %v2004_v56, %v3777_v55  ;;  %v2006_v2 = vpop.f32.mrb[5].mxu0 }
 0x2aa   : > { %v2078_v3 = vadd.f32 %v2006_v2, %v3781_v46  ;;  %v2008_v4 = vpop.f32.mrb[6].mxu0 }
 0x2ab   : > { %v2079_v5 = vadd.f32 %v2008_v4, %v3777_v55  ;;  %v2010_v6 = vpop.f32.mrb[7].mxu0 }
 0x2ac   : > { %v2729_v7 = vpack.c.bf16 %v2078_v3, %v2077_v57  ;;  %v2080_v8 = vadd.f32 %v2010_v6, %v3781_v46 }
 0x2ae   : > { %2270 = vst [vmem:[%s3789_s15 + $0x10] sm:$0xff] %v2729_v7  ;;  %v2730_v9 = vpack.c.bf16 %v2080_v8, %v2079_v5 }
 0x2b0   : > { %2271 = vst [vmem:[%s3789_s15 + $0x18] sm:$0xff] %v2730_v9  ;;  %v2014_v10 = vpop.f32.mrb[8].mxu0 }
 0x2b1   : > { %v2081_v11 = vadd.f32 %v2014_v10, %v3777_v55  ;;  %v2016_v12 = vpop.f32.mrb[9].mxu0 }
 0x2b2   : > { %v2082_v14 = vadd.f32 %v2016_v12, %v3781_v46  ;;  %v2018_v15 = vpop.f32.mrb[10].mxu0 }
 0x2b3   : > { %v2083_v16 = vadd.f32 %v2018_v15, %v3777_v55  ;;  %v2020_v17 = vpop.f32.mrb[11].mxu0 }
 0x2b4   : > { %v2731_v18 = vpack.c.bf16 %v2082_v14, %v2081_v11  ;;  %v2084_v19 = vadd.f32 %v2020_v17, %v3781_v46 }
 0x2b6   : > { %2272 = vst [vmem:[%s3789_s15 + $0x20] sm:$0xff] %v2731_v18  ;;  %v2732_v20 = vpack.c.bf16 %v2084_v19, %v2083_v16 }
 0x2b8   : > { %2273 = vst [vmem:[%s3789_s15 + $0x28] sm:$0xff] %v2732_v20  ;;  %v2024_v21 = vpop.f32.mrb[12].mxu0 }
 0x2b9   : > { %v2085_v22 = vadd.f32 %v2024_v21, %v3777_v55  ;;  %v2026_v23 = vpop.f32.mrb[13].mxu0 }
 0x2ba   : > { %v2086_v24 = vadd.f32 %v2026_v23, %v3781_v46  ;;  %v2028_v25 = vpop.f32.mrb[14].mxu0 }
 0x2bb   : > { %v2087_v26 = vadd.f32 %v2028_v25, %v3777_v55  ;;  %v2030_v27 = vpop.f32.mrb[15].mxu0 }
 0x2bc   : > { %v2733_v28 = vpack.c.bf16 %v2086_v24, %v2085_v22  ;;  %v2088_v29 = vadd.f32 %v2030_v27, %v3781_v46 }
 0x2be   : > { %2274 = vst [vmem:[%s3789_s15 + $0x30] sm:$0xff] %v2733_v28  ;;  %v2734_v30 = vpack.c.bf16 %v2088_v29, %v2087_v26 }
 0x2c0   : > { %2275 = vst [vmem:[%s3789_s15 + $0x38] sm:$0xff] %v2734_v30  ;;  %v2034_v31 = vpop.f32.mrb[16].mxu0 }
 0x2c1   : > { %v2089_v32 = vadd.f32 %v2034_v31, %v3777_v55  ;;  %v2036_v33 = vpop.f32.mrb[17].mxu0 }
 0x2c2   : > { %v2090_v34 = vadd.f32 %v2036_v33, %v3781_v46  ;;  %v2038_v35 = vpop.f32.mrb[18].mxu0 }
 0x2c3   : > { %v2091_v36 = vadd.f32 %v2038_v35, %v3777_v55  ;;  %v2040_v37 = vpop.f32.mrb[19].mxu0 }
 0x2c4   : > { %v2735_v39 = vpack.c.bf16 %v2090_v34, %v2089_v32  ;;  %v2092_v40 = vadd.f32 %v2040_v37, %v3781_v46 }
 0x2c6   : > { %2276 = vst [vmem:[%s3789_s15 + $0x40] sm:$0xff] %v2735_v39  ;;  %v2736_v58 = vpack.c.bf16 %v2092_v40, %v2091_v36 }
 0x2c8   : > { %2277 = vst [vmem:[%s3789_s15 + $0x48] sm:$0xff] %v2736_v58  ;;  %v2044_v42 = vpop.f32.mrb[20].mxu0 }
 0x2c9   : > { %v2093_v43 = vadd.f32 %v2044_v42, %v3777_v55  ;;  %v2046_v59 = vpop.f32.mrb[21].mxu0 }
 0x2ca   : > { %v2094_v44 = vadd.f32 %v2046_v59, %v3781_v46  ;;  %v2048_v45 = vpop.f32.mrb[22].mxu0 }
 0x2cb   : > { %v2095_v47 = vadd.f32 %v2048_v45, %v3777_v55  ;;  %v2050_v48 = vpop.f32.mrb[23].mxu0 }
 0x2cc   : > { %v2737_v49 = vpack.c.bf16 %v2094_v44, %v2093_v43  ;;  %v2096_v13 = vadd.f32 %v2050_v48, %v3781_v46 }
 0x2ce   : > { %2278 = vst [vmem:[%s3789_s15 + $0x50] sm:$0xff] %v2737_v49  ;;  %v2738_v38 = vpack.c.bf16 %v2096_v13, %v2095_v47 }
 0x2d0   : > { %2279 = vst [vmem:[%s3789_s15 + $0x58] sm:$0xff] %v2738_v38  ;;  %v2054_v41 = vpop.f32.mrb[24].mxu0 }
 0x2d1   : > { %v2097_v54 = vadd.f32 %v2054_v41, %v3777_v55  ;;  %v2056_v51 = vpop.f32.mrb[25].mxu0 }
 0x2d2   : > { %v2098_v52 = vadd.f32 %v2056_v51, %v3781_v46  ;;  %v2058_v53 = vpop.f32.mrb[26].mxu0 }
 0x2d3   : > { %v2099_v60 = vadd.f32 %v2058_v53, %v3777_v55  ;;  %v2060_v61 = vpop.f32.mrb[27].mxu0 }
 0x2d4   : > { %v2739_v62 = vpack.c.bf16 %v2098_v52, %v2097_v54  ;;  %v2100_v63 = vadd.f32 %v2060_v61, %v3781_v46 }
 0x2d6   : > { %2280 = vst [vmem:[%s3789_s15 + $0x60] sm:$0xff] %v2739_v62  ;;  %v2740_v0 = vpack.c.bf16 %v2100_v63, %v2099_v60 }
 0x2d8   : > { %2281 = vst [vmem:[%s3789_s15 + $0x68] sm:$0xff] %v2740_v0  ;;  %v2064_v1 = vpop.f32.mrb[28].mxu0 }
 0x2d9   : > { %v2101_v50 = vadd.f32 %v2064_v1, %v3777_v55  ;;  %v2066_v56 = vpop.f32.mrb[29].mxu0 }
 0x2da   : > { %v2102_v57 = vadd.f32 %v2066_v56, %v3781_v46  ;;  %v2068_v2 = vpop.f32.mrb[30].mxu0 }
 0x2db   : > { %v2103_v3 = vadd.f32 %v2068_v2, %v3777_v55  ;;  %v2070_v4 = vpop.f32.mrb[31].mxu0 }
 0x2dc   : > { %v2741_v5 = vpack.c.bf16 %v2102_v57, %v2101_v50  ;;  %v2104_v6 = vadd.f32 %v2070_v4, %v3781_v46 }
 0x2de   : > { %2282 = vst [vmem:[%s3789_s15 + $0x70] sm:$0xff] %v2741_v5  ;;  %v2742_v7 = vpack.c.bf16 %v2104_v6, %v2103_v3 }
 0x2e0   : > { %2283 = vst [vmem:[%s3789_s15 + $0x78] sm:$0xff] %v2742_v7 }
 0x2e1   : > { %3218 = shalt.err (!%p3215_p13)
}
 0x2e2   : > { %s3219_s18 = scalar_lea.hbm %s3838_s9, 2048  ;;  %s3223_s29 = scalar_lea.hbm %s3896_s5, 4096 }
 0x2e3   : > { %p3220_p6 = scmp.ne.s32.totalorder %s3838_s9, %s3219_s18  ;;  %p3224_p8 = scmp.lt.u32.totalorder %s3838_s9, %s3896_s5 }
 0x2e4   : > { %p3225_p1 = scmp.lt.u32.totalorder %s3223_s29, %s3219_s18  ;;  %p3227_p3 = scmp.lt.u32.totalorder %s3219_s18, %s3838_s9 }
 0x2e5   : > { %p3221_p7 = pnand %p3220_p6, %p3916_p12 }
 0x2e6   : > { %p3226_p10 = por %p3225_p1, %p3224_p8 }
 0x2e7   : > { %p3222_p2 = pneg %p3221_p7 }
 0x2e8   : > { %p3228_p5 = por %p3227_p3, %p3226_p10 }
 0x2ea   : > { %p3229_p9 = pnand %p3228_p5, %p3222_p2 }
 0x2ec   : > { %3232 = shalt.err (!%p3229_p9)
}
 0x2ed   : > { %s3308_s11 = smov 128   ;;  %s3309_s7 = smov 8  }
 0x2ee   : > { %2789 = dma.vmem_to_hbm [thread:$0]  (%p3916_p12), %s3840_s20, 2048, %s3838_s9, %s2285_s24, %s3308_s11, %s3308_s11, %s3309_s7  }
 0x2ef PF: > { %s3917_s10 = sld [smem:[#allocation16_spill]]  ;;  %s2338_s13 = sand.u32 1, %s3275_s21  }
 0x2f0   : > { %p3919_p0 = scmp.ge.s32.totalorder %s3295_s26, 2  ;;  %s2339_s17 = scalar_lea.sflag [#allocation5], %s2338_s13 }
 0x2f5   : > { %p3918_p11 = scmp.ne.s32.totalorder %s3917_s10, 0 }
 0x2f7   : > { %p2805_p4 = pnand %p3919_p0, %p3918_p11 }
 0x2f9   : > { %3266 = dma.done.wait (!%p2805_p4), %s2339_s17, 2048  }
 0x2fa   : > { %3268 = vsyncadd (!%p2805_p4), %s2339_s17, 4294965248  ;;  %s2348_s14 = scalar_lea.sflag [#allocation11], %s2338_s13 }
 0x2fb   : > { %3270 = dma.done.wait (!%p2805_p4), %s2348_s14, 4096  }
 0x2fc   : > { %3272 = vsyncadd (!%p2805_p4), %s2348_s14, 4294963200  ;;  %s27_s26 = sadd.s32 1, %s3295_s26   ;;  %s3920_s21 = smov %s3279_s22 }
 0x2fd   : > { %p24_p13 = scmp.ge.s32.totalorder %s27_s26, 4   ;;  %s3921_s22 = smov %s3283_s23 }
 0x2fe   : > { %s3922_s23 = smov %s3490_s27  ;;  %s3923_s24 = smov %s3291_s25 }
 0x2ff   : > { %s3924_s25 = smov %s3926_s16  ;;  %26 = sbr.rel (!%p24_p13) target bundleno = 9 (0x9), region = 123 }
 0x306   :  { %2353 = vsyncpa [#allocation4], 1 }
 0x307   :  { %2355 = vsyncpa [#allocation4 + $0x1], 1 }
 0x308   :  { %2356 = vsyncpa [#allocation7], 1 }
 0x309   :  { %2357 = vsyncpa [#allocation5], 1 }
 0x30a   :  { %2359 = vsyncpa [#allocation5 + $0x1], 1 }
 0x30b   :  { %2360 = vsyncpa [#allocation11], 1 }
 0x30c   :  { %2362 = vsyncpa [#allocation11 + $0x1], 1 }

</bundles_post_ra>
